<compile_context>
chip_gen: v5e
topology: v5e:2x2
jax: 0.10.0
libtpu: 0.0.40
codegen_flags: <defaults>
</compile_context>

<pallas_src>
import functools

import jax
import jax.numpy as jnp
from jax import lax
from jax.experimental import pallas as pl
from jax.experimental.pallas import tpu as pltpu

# ---- synthetic, deterministic hyper-parameters ----
K = 3             # conv kernel size
COUT = 16         # backbone conv output channels
EMB = 32          # per-modality embedding dim
CSF_HID = 32      # CSF MLP hidden width
NUM_CLASSES = 3   # AD / MCI / NC
CLS_PAD = 128     # classifier head padded to a full lane width
TAU = 0.5         # contrastive temperature
W_MP, W_MC, W_PC = 0.4, 0.3, 0.3  # weighted multi-modal contrastive weights


def _round_up(x, m):
    return ((x + m - 1) // m) * m


def _pack_layout(c_in, csf_dim):
    """Sublane offsets (multiples of 16 for bf16 tiling) inside the packed weight buffer."""
    two_kkc = 2 * K * K * c_in
    off_w1 = _round_up(two_kkc, 16)
    off_emb = _round_up(off_w1 + csf_dim, 16)
    off_cls = _round_up(off_emb + 2 * COUT + CSF_HID, 16)
    total = _round_up(off_cls + 3 * EMB, 16)
    return off_w1, off_emb, off_cls, total


# ---------------------------------------------------------------------------
# Fused Pallas kernel: encoders + contrastive loss + classifier + CE loss
# ---------------------------------------------------------------------------
def _wmcl_fused_kernel(patches_ref, avg_ref, csf_ref, wpack_ref, bias_ref,
                       label_ref, lam_ref, out_ref, *,
                       off_w1, off_emb, off_cls, rows_pad):
    f32, bf16 = jnp.float32, jnp.bfloat16
    two_kkc = patches_ref.shape[1]          # 2 * K*K*C
    bsz, csf_dim = csf_ref.shape

    # ---- packed parameters: static slices out of the two packed buffers ----
    w_conv = wpack_ref[0:two_kkc, 0:2 * COUT]                          # (72, 32) bf16
    w_csf1 = wpack_ref[off_w1:off_w1 + csf_dim, 0:CSF_HID]             # (8, 32)
    w_emb = wpack_ref[off_emb:off_emb + 2 * COUT + CSF_HID, 0:3 * EMB]  # (64, 96)
    w_cls = wpack_ref[off_cls:off_cls + 3 * EMB, :]                    # (96, 128)
    b_conv = bias_ref[0:1, 0:2 * COUT]
    b_csf1 = bias_ref[1:2, 0:CSF_HID]
    b_emb = bias_ref[2:3, 0:3 * EMB]
    b_cls = bias_ref[3:4, :]

    # ---- MRI+PET image encoders: one block-diagonal conv matmul (im2col in the
    # wrapper), ReLU, then GAP as a bf16 matmul with the precomputed averaging
    # matrix (keeps the XLU free, single MXU pass).
    h = jnp.dot(patches_ref[...], w_conv, preferred_element_type=f32) + b_conv
    h = jnp.maximum(h, 0.0)                                            # (B*HW, 32)
    g = jnp.dot(avg_ref[...], h.astype(bf16), preferred_element_type=f32)  # (B, 32)

    # ---- CSF biomarker MLP, first layer ----
    hc = jnp.dot(csf_ref[...], w_csf1, preferred_element_type=f32) + b_csf1
    hc = jnp.maximum(hc, 0.0)                                          # (B, 32)

    # ---- fused embedding projections: [g | hc] @ blockdiag(wproj_m, wproj_p, csf_w2)
    x_emb = jnp.concatenate([g.astype(bf16), hc.astype(bf16)], axis=1)  # (B, 64)
    z_all = jnp.dot(x_emb, w_emb, preferred_element_type=f32) + b_emb   # (B, 96)
    z_mri = z_all[:, 0:EMB]
    z_pet = z_all[:, EMB:2 * EMB]
    z_csf = z_all[:, 2 * EMB:3 * EMB]

    # ---- weighted multi-modal contrastive loss (symmetric InfoNCE per pair) ----
    def l2norm(z):
        return (z * lax.rsqrt(jnp.sum(z * z, axis=-1, keepdims=True) + 1e-8)).astype(bf16)

    nm, npt, nc = l2norm(z_mri), l2norm(z_pet), l2norm(z_csf)
    eye = (lax.broadcasted_iota(jnp.int32, (bsz, bsz), 0) ==
           lax.broadcasted_iota(jnp.int32, (bsz, bsz), 1)).astype(f32)

    def info_nce(a, c):
        sim = lax.dot_general(a, c, (((1,), (1,)), ((), ())),
                              preferred_element_type=f32) / TAU        # (B, B)
        # row direction (anchor = a): softmax over axis 1
        mr = jnp.max(sim, axis=1, keepdims=True)
        lse_r = mr + jnp.log(jnp.sum(jnp.exp(sim - mr), axis=1, keepdims=True))
        pos_r = jnp.sum(sim * eye, axis=1, keepdims=True)
        loss_r = jnp.mean(lse_r - pos_r, axis=0, keepdims=True)        # (1, 1)
        # column direction (anchor = c): reduce over axis 0 — no transpose
        mc = jnp.max(sim, axis=0, keepdims=True)
        lse_c = mc + jnp.log(jnp.sum(jnp.exp(sim - mc), axis=0, keepdims=True))
        pos_c = jnp.sum(sim * eye, axis=0, keepdims=True)
        loss_c = jnp.mean(lse_c - pos_c, axis=1, keepdims=True)        # (1, 1)
        return 0.5 * (loss_r + loss_c)

    loss_cl = (W_MP * info_nce(nm, npt)
               + W_MC * info_nce(nm, nc)
               + W_PC * info_nce(npt, nc))                             # (1, 1)

    # ---- fused fusion-classifier matmul, padded to rows_pad sublanes so the
    # final store is a full-tile unmasked vst ----
    pad_m = rows_pad - bsz
    z_cls_in = jnp.concatenate(
        [z_all.astype(bf16), jnp.zeros((pad_m, 3 * EMB), bf16)], axis=0)      # (rows_pad, 96)
    logits_full = jnp.dot(z_cls_in, w_cls, preferred_element_type=f32) + b_cls  # (rows_pad, 128)

    # ---- softmax cross-entropy on the first bsz rows / NUM_CLASSES lanes ----
    lane = lax.broadcasted_iota(jnp.int32, (rows_pad, CLS_PAD), 1)
    row = lax.broadcasted_iota(jnp.int32, (rows_pad, CLS_PAD), 0)
    masked = jnp.where(lane < NUM_CLASSES, logits_full, -1e30)
    mx = jnp.max(masked, axis=1, keepdims=True)
    # exp(-1e30 - mx) underflows to 0 -> no extra select needed on pad lanes
    lse = mx + jnp.log(jnp.sum(jnp.exp(masked - mx), axis=1, keepdims=True))
    onehot = jnp.zeros((rows_pad, CLS_PAD), f32)
    for i in range(bsz):                      # labels live in SMEM -> cheap scalar reads
        onehot = onehot + jnp.where((row == i) & (lane == label_ref[i]), 1.0, 0.0)
    pos = jnp.sum(onehot * logits_full, axis=1, keepdims=True)
    rowv = lax.broadcasted_iota(jnp.int32, (rows_pad, 1), 0)
    nll = jnp.where(rowv < bsz, lse - pos, 0.0)                        # pad rows masked out
    loss_classifier = jnp.sum(nll, axis=0, keepdims=True) / bsz        # (1, 1)

    lam = lam_ref[0, 0]                                                # scalar from SMEM
    loss_hybrid = lam * loss_cl + (1.0 - lam) * loss_classifier        # (1, 1)

    # ---- single lane-dense output slab:
    #   rows [0, bsz)      : padded logits
    #   row rows_pad - 1   : lane0=loss_hybrid, lane1=loss_classifier, lane2=loss_cl
    lane1 = lax.broadcasted_iota(jnp.int32, (1, CLS_PAD), 1)
    loss_row = jnp.where(lane1 == 0, loss_hybrid,
                         jnp.where(lane1 == 1, loss_classifier,
                                   jnp.where(lane1 == 2, loss_cl, 0.0)))
    out_ref[...] = jnp.where(row == rows_pad - 1, loss_row, logits_full)


# ---------------------------------------------------------------------------
# Wrappers (glue)
# ---------------------------------------------------------------------------
def _im2col_same3x3(x_nhwc):
    b, h, w, c = x_nhwc.shape
    xp = jnp.pad(x_nhwc, ((0, 0), (1, 1), (1, 1), (0, 0)))
    cols = [xp[:, dh:dh + h, dw:dw + w, :] for dh in range(K) for dw in range(K)]
    patches = jnp.concatenate(cols, axis=-1)                # (B, H, W, K*K*C)
    return patches.reshape(b * h * w, K * K * c)            # (B*H*W, K*K*C)


def init_params(key, c_in, csf_dim):
    ks = jax.random.split(key, 7)
    s = 0.1
    f32, bf16 = jnp.float32, jnp.bfloat16
    kkc = K * K * c_in

    wconv_m = jax.random.normal(ks[0], (kkc, COUT), f32) * s
    wconv_p = jax.random.normal(ks[1], (kkc, COUT), f32) * s
    wproj_m = jax.random.normal(ks[2], (COUT, EMB), f32) * s
    wproj_p = jax.random.normal(ks[3], (COUT, EMB), f32) * s
    csf_w1 = jax.random.normal(ks[4], (csf_dim, CSF_HID), f32) * s
    csf_w2 = jax.random.normal(ks[5], (CSF_HID, EMB), f32) * s
    cls_w = jax.random.normal(ks[6], (3 * EMB, NUM_CLASSES), f32) * s

    off_w1, off_emb, off_cls, total = _pack_layout(c_in, csf_dim)

    # Block-diagonal fusions: one MXU pass per stage instead of 2-3.
    wconv_bd = jnp.zeros((2 * kkc, 2 * COUT), f32)
    wconv_bd = wconv_bd.at[0:kkc, 0:COUT].set(wconv_m)
    wconv_bd = wconv_bd.at[kkc:, COUT:].set(wconv_p)
    wemb_bd = jnp.zeros((2 * COUT + CSF_HID, 3 * EMB), f32)
    wemb_bd = wemb_bd.at[0:COUT, 0:EMB].set(wproj_m)
    wemb_bd = wemb_bd.at[COUT:2 * COUT, EMB:2 * EMB].set(wproj_p)
    wemb_bd = wemb_bd.at[2 * COUT:, 2 * EMB:].set(csf_w2)

    # ALL matmul weights packed into ONE bf16 buffer -> single HBM->VMEM DMA.
    wpack = jnp.zeros((total, CLS_PAD), f32)
    wpack = wpack.at[0:2 * kkc, 0:2 * COUT].set(wconv_bd)
    wpack = wpack.at[off_w1:off_w1 + csf_dim, 0:CSF_HID].set(csf_w1)
    wpack = wpack.at[off_emb:off_emb + 2 * COUT + CSF_HID, 0:3 * EMB].set(wemb_bd)
    wpack = wpack.at[off_cls:off_cls + 3 * EMB, 0:NUM_CLASSES].set(cls_w)

    # ALL biases packed into ONE f32 buffer: rows = conv | csf1 | embed | cls.
    biases = jnp.zeros((4, CLS_PAD), f32)

    return {"wpack": wpack.astype(bf16), "biases": biases}


def wmcl_hn_forward(params, mri, pet, csf, label, lambda_):
    """Equivalent of WMCL_HN.forward(mri, pet, csf, label, lambda_)."""
    f32, bf16 = jnp.float32, jnp.bfloat16
    bsz, c_in, hgt, wid = mri.shape
    hw = hgt * wid
    csf_dim = csf.shape[1]
    off_w1, off_emb, off_cls, _ = _pack_layout(c_in, csf_dim)
    rows_pad = _round_up(bsz + 1, 8)

    # NCHW -> NHWC -> 3x3 same-padding im2col; both modalities concatenated on
    # the feature axis so the conv runs as one block-diagonal matmul (bf16
    # inputs, f32 accumulation inside the kernel).
    mri_p = _im2col_same3x3(jnp.transpose(mri, (0, 2, 3, 1)).astype(f32))
    pet_p = _im2col_same3x3(jnp.transpose(pet, (0, 2, 3, 1)).astype(f32))
    patches = jnp.concatenate([mri_p, pet_p], axis=1).astype(bf16)   # (B*HW, 2*KKC)

    # GAP-as-matmul averaging matrix, hoisted out of the kernel (static B, HW).
    rows = jnp.arange(bsz, dtype=jnp.int32)[:, None]
    cols = jnp.arange(bsz * hw, dtype=jnp.int32)[None, :]
    avg = jnp.where((cols >= rows * hw) & (cols < (rows + 1) * hw),
                    1.0 / hw, 0.0).astype(bf16)                      # (B, B*HW)

    kernel = functools.partial(_wmcl_fused_kernel, off_w1=off_w1, off_emb=off_emb,
                               off_cls=off_cls, rows_pad=rows_pad)

    out = pl.pallas_call(
        kernel,
        out_shape=jax.ShapeDtypeStruct((rows_pad, CLS_PAD), f32),
        in_specs=[
            pl.BlockSpec(memory_space=pltpu.MemorySpace.VMEM),   # patches
            pl.BlockSpec(memory_space=pltpu.MemorySpace.VMEM),   # avg matrix
            pl.BlockSpec(memory_space=pltpu.MemorySpace.VMEM),   # csf
            pl.BlockSpec(memory_space=pltpu.MemorySpace.VMEM),   # packed weights
            pl.BlockSpec(memory_space=pltpu.MemorySpace.VMEM),   # packed biases
            pl.BlockSpec(memory_space=pltpu.MemorySpace.SMEM),   # label
            pl.BlockSpec(memory_space=pltpu.MemorySpace.SMEM),   # lambda
        ],
        out_specs=pl.BlockSpec(memory_space=pltpu.MemorySpace.VMEM),
    )(patches, avg, csf.astype(bf16),
      params["wpack"], params["biases"],
      label.astype(jnp.int32),
      jnp.asarray(lambda_, f32).reshape(1, 1))

    output = out[:bsz, :NUM_CLASSES]
    loss_hybrid = out[rows_pad - 1, 0]
    loss_classifier = out[rows_pad - 1, 1]
    return loss_hybrid, output, loss_classifier


if __name__ == "__main__":
    B, C_IN, H, W = 2, 4, 16, 16
    CSF_DIM = 8

    key = jax.random.PRNGKey(0)
    k_mri, k_pet, k_csf, k_lab, k_param = jax.random.split(key, 5)

    mri = jax.random.normal(k_mri, (B, C_IN, H, W), jnp.float32)   # NCHW like PyTorch
    pet = jax.random.normal(k_pet, (B, C_IN, H, W), jnp.float32)
    csf = jax.random.normal(k_csf, (B, CSF_DIM), jnp.float32)
    label = jax.random.randint(k_lab, (B,), 0, NUM_CLASSES, jnp.int32)
    lambda_ = 0.5

    params = init_params(k_param, C_IN, CSF_DIM)

    fwd = jax.jit(wmcl_hn_forward)
    loss_hybrid, output, loss_classifier = fwd(params, mri, pet, csf, label, lambda_)
    jax.block_until_ready((loss_hybrid, output, loss_classifier))

    print("KERNEL_OK")
</pallas_src>

<mosaic_0001>
module attributes {stable_mosaic.version = 11 : i64} {
  func.func @_wmcl_fused_kernel(%arg0: memref<512x72xbf16, #tpu.memory_space<vmem>>, %arg1: memref<2x512xbf16, #tpu.memory_space<vmem>>, %arg2: memref<2x8xbf16, #tpu.memory_space<vmem>>, %arg3: memref<256x128xbf16, #tpu.memory_space<vmem>>, %arg4: memref<4x128xf32, #tpu.memory_space<vmem>>, %arg5: memref<2xi32, #tpu.memory_space<smem>>, %arg6: memref<1x1xf32, #tpu.memory_space<smem>>, %arg7: memref<8x128xf32, #tpu.memory_space<vmem>>) attributes {dimension_semantics = [], scalar_prefetch = 0 : i64, scratch_operands = 0 : i64, tpu.core_type = #tpu.core_type<tc>} {
    %c0 = arith.constant 0 : index
    %c0_0 = arith.constant 0 : index
    %0 = vector.load %arg3[%c0, %c0_0] : memref<256x128xbf16, #tpu.memory_space<vmem>>, vector<72x32xbf16>
    %c80 = arith.constant 80 : index
    %c0_1 = arith.constant 0 : index
    %1 = vector.load %arg3[%c80, %c0_1] : memref<256x128xbf16, #tpu.memory_space<vmem>>, vector<8x32xbf16>
    %c96 = arith.constant 96 : index
    %c0_2 = arith.constant 0 : index
    %2 = vector.load %arg3[%c96, %c0_2] : memref<256x128xbf16, #tpu.memory_space<vmem>>, vector<64x96xbf16>
    %c160 = arith.constant 160 : index
    %c0_3 = arith.constant 0 : index
    %3 = vector.load %arg3[%c160, %c0_3] : memref<256x128xbf16, #tpu.memory_space<vmem>>, vector<96x128xbf16>
    %c0_4 = arith.constant 0 : index
    %c0_5 = arith.constant 0 : index
    %4 = vector.load %arg4[%c0_4, %c0_5] : memref<4x128xf32, #tpu.memory_space<vmem>>, vector<1x32xf32>
    %c1 = arith.constant 1 : index
    %c0_6 = arith.constant 0 : index
    %5 = vector.load %arg4[%c1, %c0_6] : memref<4x128xf32, #tpu.memory_space<vmem>>, vector<1x32xf32>
    %c2 = arith.constant 2 : index
    %c0_7 = arith.constant 0 : index
    %6 = vector.load %arg4[%c2, %c0_7] : memref<4x128xf32, #tpu.memory_space<vmem>>, vector<1x96xf32>
    %c3 = arith.constant 3 : index
    %c0_8 = arith.constant 0 : index
    %7 = vector.load %arg4[%c3, %c0_8] : memref<4x128xf32, #tpu.memory_space<vmem>>, vector<1x128xf32>
    %c0_9 = arith.constant 0 : index
    %c0_10 = arith.constant 0 : index
    %8 = vector.load %arg0[%c0_9, %c0_10] : memref<512x72xbf16, #tpu.memory_space<vmem>>, vector<512x72xbf16>
    %cst = arith.constant dense<0.000000e+00> : vector<512x32xf32>
    %9 = tpu.matmul %8, %0, %cst {dimension_numbers = #tpu.dot_dimension_numbers<[1], [0], [0], [1], [0, 0, 1, 1], [], []>} : vector<512x72xbf16>, vector<72x32xbf16>, vector<512x32xf32> -> vector<512x32xf32>
    %10 = vector.broadcast %4 : vector<1x32xf32> to vector<512x32xf32>
    %11 = arith.addf %9, %10 : vector<512x32xf32>
    %cst_11 = arith.constant 0.000000e+00 : f32
    %12 = vector.broadcast %cst_11 : f32 to vector<512x32xf32>
    %13 = arith.maximumf %11, %12 : vector<512x32xf32>
    %c0_12 = arith.constant 0 : index
    %c0_13 = arith.constant 0 : index
    %14 = vector.load %arg1[%c0_12, %c0_13] : memref<2x512xbf16, #tpu.memory_space<vmem>>, vector<2x512xbf16>
    %15 = arith.truncf %13 : vector<512x32xf32> to vector<512x32xbf16>
    %cst_14 = arith.constant dense<0.000000e+00> : vector<2x32xf32>
    %16 = tpu.matmul %14, %15, %cst_14 {dimension_numbers = #tpu.dot_dimension_numbers<[1], [0], [0], [1], [0, 0, 1, 1], [], []>} : vector<2x512xbf16>, vector<512x32xbf16>, vector<2x32xf32> -> vector<2x32xf32>
    %c0_15 = arith.constant 0 : index
    %c0_16 = arith.constant 0 : index
    %17 = vector.load %arg2[%c0_15, %c0_16] : memref<2x8xbf16, #tpu.memory_space<vmem>>, vector<2x8xbf16>
    %cst_17 = arith.constant dense<0.000000e+00> : vector<2x32xf32>
    %18 = tpu.matmul %17, %1, %cst_17 {dimension_numbers = #tpu.dot_dimension_numbers<[1], [0], [0], [1], [0, 0, 1, 1], [], []>} : vector<2x8xbf16>, vector<8x32xbf16>, vector<2x32xf32> -> vector<2x32xf32>
    %19 = vector.broadcast %5 : vector<1x32xf32> to vector<2x32xf32>
    %20 = arith.addf %18, %19 : vector<2x32xf32>
    %cst_18 = arith.constant 0.000000e+00 : f32
    %21 = vector.broadcast %cst_18 : f32 to vector<2x32xf32>
    %22 = arith.maximumf %20, %21 : vector<2x32xf32>
    %23 = arith.truncf %16 : vector<2x32xf32> to vector<2x32xbf16>
    %24 = arith.truncf %22 : vector<2x32xf32> to vector<2x32xbf16>
    %25 = tpu.concatenate %23, %24 in 1 : vector<2x32xbf16>, vector<2x32xbf16> -> vector<2x64xbf16>
    %cst_19 = arith.constant dense<0.000000e+00> : vector<2x96xf32>
    %26 = tpu.matmul %25, %2, %cst_19 {dimension_numbers = #tpu.dot_dimension_numbers<[1], [0], [0], [1], [0, 0, 1, 1], [], []>} : vector<2x64xbf16>, vector<64x96xbf16>, vector<2x96xf32> -> vector<2x96xf32>
    %27 = vector.broadcast %6 : vector<1x96xf32> to vector<2x96xf32>
    %28 = arith.addf %26, %27 : vector<2x96xf32>
    %29 = vector.extract_strided_slice %28 {offsets = [0, 0], sizes = [2, 32], strides = [1, 1]} : vector<2x96xf32> to vector<2x32xf32>
    %30 = vector.extract_strided_slice %28 {offsets = [0, 32], sizes = [2, 32], strides = [1, 1]} : vector<2x96xf32> to vector<2x32xf32>
    %31 = vector.extract_strided_slice %28 {offsets = [0, 64], sizes = [2, 32], strides = [1, 1]} : vector<2x96xf32> to vector<2x32xf32>
    %32 = arith.mulf %29, %29 : vector<2x32xf32>
    %cst_20 = arith.constant dense<0.000000e+00> : vector<2xf32>
    %33 = vector.multi_reduction <add>, %32, %cst_20 [1] : vector<2x32xf32> to vector<2xf32>
    %34 = vector.shape_cast %33 : vector<2xf32> to vector<2x1xf32>
    %cst_21 = arith.constant 9.99999993E-9 : f32
    %35 = vector.broadcast %cst_21 : f32 to vector<2x1xf32>
    %36 = arith.addf %34, %35 : vector<2x1xf32>
    %37 = math.rsqrt %36 : vector<2x1xf32>
    %38 = vector.broadcast %37 : vector<2x1xf32> to vector<2x32xf32>
    %39 = arith.mulf %29, %38 : vector<2x32xf32>
    %40 = arith.truncf %39 : vector<2x32xf32> to vector<2x32xbf16>
    %41 = arith.mulf %30, %30 : vector<2x32xf32>
    %cst_22 = arith.constant dense<0.000000e+00> : vector<2xf32>
    %42 = vector.multi_reduction <add>, %41, %cst_22 [1] : vector<2x32xf32> to vector<2xf32>
    %43 = vector.shape_cast %42 : vector<2xf32> to vector<2x1xf32>
    %cst_23 = arith.constant 9.99999993E-9 : f32
    %44 = vector.broadcast %cst_23 : f32 to vector<2x1xf32>
    %45 = arith.addf %43, %44 : vector<2x1xf32>
    %46 = math.rsqrt %45 : vector<2x1xf32>
    %47 = vector.broadcast %46 : vector<2x1xf32> to vector<2x32xf32>
    %48 = arith.mulf %30, %47 : vector<2x32xf32>
    %49 = arith.truncf %48 : vector<2x32xf32> to vector<2x32xbf16>
    %50 = arith.mulf %31, %31 : vector<2x32xf32>
    %cst_24 = arith.constant dense<0.000000e+00> : vector<2xf32>
    %51 = vector.multi_reduction <add>, %50, %cst_24 [1] : vector<2x32xf32> to vector<2xf32>
    %52 = vector.shape_cast %51 : vector<2xf32> to vector<2x1xf32>
    %cst_25 = arith.constant 9.99999993E-9 : f32
    %53 = vector.broadcast %cst_25 : f32 to vector<2x1xf32>
    %54 = arith.addf %52, %53 : vector<2x1xf32>
    %55 = math.rsqrt %54 : vector<2x1xf32>
    %56 = vector.broadcast %55 : vector<2x1xf32> to vector<2x32xf32>
    %57 = arith.mulf %31, %56 : vector<2x32xf32>
    %58 = arith.truncf %57 : vector<2x32xf32> to vector<2x32xbf16>
    %59 = tpu.iota {dimensions = array<i32: 0>} : vector<2x2xi32>
    %60 = tpu.iota {dimensions = array<i32: 1>} : vector<2x2xi32>
    %61 = arith.cmpi eq, %59, %60 : vector<2x2xi32>
    %62 = arith.extui %61 : vector<2x2xi1> to vector<2x2xi32>
    %63 = arith.sitofp %62 : vector<2x2xi32> to vector<2x2xf32>
    %cst_26 = arith.constant dense<0.000000e+00> : vector<2x2xf32>
    %64 = tpu.matmul %40, %49, %cst_26 {dimension_numbers = #tpu.dot_dimension_numbers<[1], [1], [0], [0], [0, 0, 1, 0], [], []>} : vector<2x32xbf16>, vector<2x32xbf16>, vector<2x2xf32> -> vector<2x2xf32>
    %cst_27 = arith.constant 5.000000e-01 : f32
    %65 = vector.broadcast %cst_27 : f32 to vector<2x2xf32>
    %66 = arith.divf %64, %65 : vector<2x2xf32>
    %cst_28 = arith.constant dense<0xFF800000> : vector<2xf32>
    %67 = vector.multi_reduction <maximumf>, %66, %cst_28 [1] : vector<2x2xf32> to vector<2xf32>
    %68 = vector.shape_cast %67 : vector<2xf32> to vector<2x1xf32>
    %69 = vector.broadcast %68 : vector<2x1xf32> to vector<2x2xf32>
    %70 = arith.subf %66, %69 : vector<2x2xf32>
    %71 = math.exp %70 : vector<2x2xf32>
    %cst_29 = arith.constant dense<0.000000e+00> : vector<2xf32>
    %72 = vector.multi_reduction <add>, %71, %cst_29 [1] : vector<2x2xf32> to vector<2xf32>
    %73 = vector.shape_cast %72 : vector<2xf32> to vector<2x1xf32>
    %74 = math.log %73 : vector<2x1xf32>
    %75 = arith.addf %68, %74 : vector<2x1xf32>
    %76 = arith.mulf %66, %63 : vector<2x2xf32>
    %cst_30 = arith.constant dense<0.000000e+00> : vector<2xf32>
    %77 = vector.multi_reduction <add>, %76, %cst_30 [1] : vector<2x2xf32> to vector<2xf32>
    %78 = vector.shape_cast %77 : vector<2xf32> to vector<2x1xf32>
    %79 = arith.subf %75, %78 : vector<2x1xf32>
    %cst_31 = arith.constant dense<0.000000e+00> : vector<1xf32>
    %80 = vector.multi_reduction <add>, %79, %cst_31 [0] : vector<2x1xf32> to vector<1xf32>
    %81 = vector.shape_cast %80 : vector<1xf32> to vector<1x1xf32>
    %cst_32 = arith.constant 2.000000e+00 : f32
    %82 = vector.broadcast %cst_32 : f32 to vector<1x1xf32>
    %83 = arith.divf %81, %82 : vector<1x1xf32>
    %cst_33 = arith.constant dense<0xFF800000> : vector<2xf32>
    %84 = vector.multi_reduction <maximumf>, %66, %cst_33 [0] : vector<2x2xf32> to vector<2xf32>
    %85 = vector.shape_cast %84 : vector<2xf32> to vector<1x2xf32>
    %86 = vector.broadcast %85 : vector<1x2xf32> to vector<2x2xf32>
    %87 = arith.subf %66, %86 : vector<2x2xf32>
    %88 = math.exp %87 : vector<2x2xf32>
    %cst_34 = arith.constant dense<0.000000e+00> : vector<2xf32>
    %89 = vector.multi_reduction <add>, %88, %cst_34 [0] : vector<2x2xf32> to vector<2xf32>
    %90 = vector.shape_cast %89 : vector<2xf32> to vector<1x2xf32>
    %91 = math.log %90 : vector<1x2xf32>
    %92 = arith.addf %85, %91 : vector<1x2xf32>
    %93 = arith.mulf %66, %63 : vector<2x2xf32>
    %cst_35 = arith.constant dense<0.000000e+00> : vector<2xf32>
    %94 = vector.multi_reduction <add>, %93, %cst_35 [0] : vector<2x2xf32> to vector<2xf32>
    %95 = vector.shape_cast %94 : vector<2xf32> to vector<1x2xf32>
    %96 = arith.subf %92, %95 : vector<1x2xf32>
    %cst_36 = arith.constant dense<0.000000e+00> : vector<1xf32>
    %97 = vector.multi_reduction <add>, %96, %cst_36 [1] : vector<1x2xf32> to vector<1xf32>
    %98 = vector.shape_cast %97 : vector<1xf32> to vector<1x1xf32>
    %cst_37 = arith.constant 2.000000e+00 : f32
    %99 = vector.broadcast %cst_37 : f32 to vector<1x1xf32>
    %100 = arith.divf %98, %99 : vector<1x1xf32>
    %101 = arith.addf %83, %100 : vector<1x1xf32>
    %cst_38 = arith.constant 5.000000e-01 : f32
    %102 = vector.broadcast %cst_38 : f32 to vector<1x1xf32>
    %103 = arith.mulf %102, %101 : vector<1x1xf32>
    %cst_39 = arith.constant 4.000000e-01 : f32
    %104 = vector.broadcast %cst_39 : f32 to vector<1x1xf32>
    %105 = arith.mulf %104, %103 : vector<1x1xf32>
    %cst_40 = arith.constant dense<0.000000e+00> : vector<2x2xf32>
    %106 = tpu.matmul %40, %58, %cst_40 {dimension_numbers = #tpu.dot_dimension_numbers<[1], [1], [0], [0], [0, 0, 1, 0], [], []>} : vector<2x32xbf16>, vector<2x32xbf16>, vector<2x2xf32> -> vector<2x2xf32>
    %cst_41 = arith.constant 5.000000e-01 : f32
    %107 = vector.broadcast %cst_41 : f32 to vector<2x2xf32>
    %108 = arith.divf %106, %107 : vector<2x2xf32>
    %cst_42 = arith.constant dense<0xFF800000> : vector<2xf32>
    %109 = vector.multi_reduction <maximumf>, %108, %cst_42 [1] : vector<2x2xf32> to vector<2xf32>
    %110 = vector.shape_cast %109 : vector<2xf32> to vector<2x1xf32>
    %111 = vector.broadcast %110 : vector<2x1xf32> to vector<2x2xf32>
    %112 = arith.subf %108, %111 : vector<2x2xf32>
    %113 = math.exp %112 : vector<2x2xf32>
    %cst_43 = arith.constant dense<0.000000e+00> : vector<2xf32>
    %114 = vector.multi_reduction <add>, %113, %cst_43 [1] : vector<2x2xf32> to vector<2xf32>
    %115 = vector.shape_cast %114 : vector<2xf32> to vector<2x1xf32>
    %116 = math.log %115 : vector<2x1xf32>
    %117 = arith.addf %110, %116 : vector<2x1xf32>
    %118 = arith.mulf %108, %63 : vector<2x2xf32>
    %cst_44 = arith.constant dense<0.000000e+00> : vector<2xf32>
    %119 = vector.multi_reduction <add>, %118, %cst_44 [1] : vector<2x2xf32> to vector<2xf32>
    %120 = vector.shape_cast %119 : vector<2xf32> to vector<2x1xf32>
    %121 = arith.subf %117, %120 : vector<2x1xf32>
    %cst_45 = arith.constant dense<0.000000e+00> : vector<1xf32>
    %122 = vector.multi_reduction <add>, %121, %cst_45 [0] : vector<2x1xf32> to vector<1xf32>
    %123 = vector.shape_cast %122 : vector<1xf32> to vector<1x1xf32>
    %cst_46 = arith.constant 2.000000e+00 : f32
    %124 = vector.broadcast %cst_46 : f32 to vector<1x1xf32>
    %125 = arith.divf %123, %124 : vector<1x1xf32>
    %cst_47 = arith.constant dense<0xFF800000> : vector<2xf32>
    %126 = vector.multi_reduction <maximumf>, %108, %cst_47 [0] : vector<2x2xf32> to vector<2xf32>
    %127 = vector.shape_cast %126 : vector<2xf32> to vector<1x2xf32>
    %128 = vector.broadcast %127 : vector<1x2xf32> to vector<2x2xf32>
    %129 = arith.subf %108, %128 : vector<2x2xf32>
    %130 = math.exp %129 : vector<2x2xf32>
    %cst_48 = arith.constant dense<0.000000e+00> : vector<2xf32>
    %131 = vector.multi_reduction <add>, %130, %cst_48 [0] : vector<2x2xf32> to vector<2xf32>
    %132 = vector.shape_cast %131 : vector<2xf32> to vector<1x2xf32>
    %133 = math.log %132 : vector<1x2xf32>
    %134 = arith.addf %127, %133 : vector<1x2xf32>
    %135 = arith.mulf %108, %63 : vector<2x2xf32>
    %cst_49 = arith.constant dense<0.000000e+00> : vector<2xf32>
    %136 = vector.multi_reduction <add>, %135, %cst_49 [0] : vector<2x2xf32> to vector<2xf32>
    %137 = vector.shape_cast %136 : vector<2xf32> to vector<1x2xf32>
    %138 = arith.subf %134, %137 : vector<1x2xf32>
    %cst_50 = arith.constant dense<0.000000e+00> : vector<1xf32>
    %139 = vector.multi_reduction <add>, %138, %cst_50 [1] : vector<1x2xf32> to vector<1xf32>
    %140 = vector.shape_cast %139 : vector<1xf32> to vector<1x1xf32>
    %cst_51 = arith.constant 2.000000e+00 : f32
    %141 = vector.broadcast %cst_51 : f32 to vector<1x1xf32>
    %142 = arith.divf %140, %141 : vector<1x1xf32>
    %143 = arith.addf %125, %142 : vector<1x1xf32>
    %cst_52 = arith.constant 5.000000e-01 : f32
    %144 = vector.broadcast %cst_52 : f32 to vector<1x1xf32>
    %145 = arith.mulf %144, %143 : vector<1x1xf32>
    %cst_53 = arith.constant 3.000000e-01 : f32
    %146 = vector.broadcast %cst_53 : f32 to vector<1x1xf32>
    %147 = arith.mulf %146, %145 : vector<1x1xf32>
    %148 = arith.addf %105, %147 : vector<1x1xf32>
    %cst_54 = arith.constant dense<0.000000e+00> : vector<2x2xf32>
    %149 = tpu.matmul %49, %58, %cst_54 {dimension_numbers = #tpu.dot_dimension_numbers<[1], [1], [0], [0], [0, 0, 1, 0], [], []>} : vector<2x32xbf16>, vector<2x32xbf16>, vector<2x2xf32> -> vector<2x2xf32>
    %cst_55 = arith.constant 5.000000e-01 : f32
    %150 = vector.broadcast %cst_55 : f32 to vector<2x2xf32>
    %151 = arith.divf %149, %150 : vector<2x2xf32>
    %cst_56 = arith.constant dense<0xFF800000> : vector<2xf32>
    %152 = vector.multi_reduction <maximumf>, %151, %cst_56 [1] : vector<2x2xf32> to vector<2xf32>
    %153 = vector.shape_cast %152 : vector<2xf32> to vector<2x1xf32>
    %154 = vector.broadcast %153 : vector<2x1xf32> to vector<2x2xf32>
    %155 = arith.subf %151, %154 : vector<2x2xf32>
    %156 = math.exp %155 : vector<2x2xf32>
    %cst_57 = arith.constant dense<0.000000e+00> : vector<2xf32>
    %157 = vector.multi_reduction <add>, %156, %cst_57 [1] : vector<2x2xf32> to vector<2xf32>
    %158 = vector.shape_cast %157 : vector<2xf32> to vector<2x1xf32>
    %159 = math.log %158 : vector<2x1xf32>
    %160 = arith.addf %153, %159 : vector<2x1xf32>
    %161 = arith.mulf %151, %63 : vector<2x2xf32>
    %cst_58 = arith.constant dense<0.000000e+00> : vector<2xf32>
    %162 = vector.multi_reduction <add>, %161, %cst_58 [1] : vector<2x2xf32> to vector<2xf32>
    %163 = vector.shape_cast %162 : vector<2xf32> to vector<2x1xf32>
    %164 = arith.subf %160, %163 : vector<2x1xf32>
    %cst_59 = arith.constant dense<0.000000e+00> : vector<1xf32>
    %165 = vector.multi_reduction <add>, %164, %cst_59 [0] : vector<2x1xf32> to vector<1xf32>
    %166 = vector.shape_cast %165 : vector<1xf32> to vector<1x1xf32>
    %cst_60 = arith.constant 2.000000e+00 : f32
    %167 = vector.broadcast %cst_60 : f32 to vector<1x1xf32>
    %168 = arith.divf %166, %167 : vector<1x1xf32>
    %cst_61 = arith.constant dense<0xFF800000> : vector<2xf32>
    %169 = vector.multi_reduction <maximumf>, %151, %cst_61 [0] : vector<2x2xf32> to vector<2xf32>
    %170 = vector.shape_cast %169 : vector<2xf32> to vector<1x2xf32>
    %171 = vector.broadcast %170 : vector<1x2xf32> to vector<2x2xf32>
    %172 = arith.subf %151, %171 : vector<2x2xf32>
    %173 = math.exp %172 : vector<2x2xf32>
    %cst_62 = arith.constant dense<0.000000e+00> : vector<2xf32>
    %174 = vector.multi_reduction <add>, %173, %cst_62 [0] : vector<2x2xf32> to vector<2xf32>
    %175 = vector.shape_cast %174 : vector<2xf32> to vector<1x2xf32>
    %176 = math.log %175 : vector<1x2xf32>
    %177 = arith.addf %170, %176 : vector<1x2xf32>
    %178 = arith.mulf %151, %63 : vector<2x2xf32>
    %cst_63 = arith.constant dense<0.000000e+00> : vector<2xf32>
    %179 = vector.multi_reduction <add>, %178, %cst_63 [0] : vector<2x2xf32> to vector<2xf32>
    %180 = vector.shape_cast %179 : vector<2xf32> to vector<1x2xf32>
    %181 = arith.subf %177, %180 : vector<1x2xf32>
    %cst_64 = arith.constant dense<0.000000e+00> : vector<1xf32>
    %182 = vector.multi_reduction <add>, %181, %cst_64 [1] : vector<1x2xf32> to vector<1xf32>
    %183 = vector.shape_cast %182 : vector<1xf32> to vector<1x1xf32>
    %cst_65 = arith.constant 2.000000e+00 : f32
    %184 = vector.broadcast %cst_65 : f32 to vector<1x1xf32>
    %185 = arith.divf %183, %184 : vector<1x1xf32>
    %186 = arith.addf %168, %185 : vector<1x1xf32>
    %cst_66 = arith.constant 5.000000e-01 : f32
    %187 = vector.broadcast %cst_66 : f32 to vector<1x1xf32>
    %188 = arith.mulf %187, %186 : vector<1x1xf32>
    %cst_67 = arith.constant 3.000000e-01 : f32
    %189 = vector.broadcast %cst_67 : f32 to vector<1x1xf32>
    %190 = arith.mulf %189, %188 : vector<1x1xf32>
    %191 = arith.addf %148, %190 : vector<1x1xf32>
    %192 = arith.truncf %28 : vector<2x96xf32> to vector<2x96xbf16>
    %cst_68 = arith.constant 0.000000e+00 : bf16
    %193 = vector.broadcast %cst_68 : bf16 to vector<6x96xbf16>
    %194 = tpu.concatenate %192, %193 in 0 : vector<2x96xbf16>, vector<6x96xbf16> -> vector<8x96xbf16>
    %cst_69 = arith.constant dense<0.000000e+00> : vector<8x128xf32>
    %195 = tpu.matmul %194, %3, %cst_69 {dimension_numbers = #tpu.dot_dimension_numbers<[1], [0], [0], [1], [0, 0, 1, 1], [], []>} : vector<8x96xbf16>, vector<96x128xbf16>, vector<8x128xf32> -> vector<8x128xf32>
    %196 = vector.broadcast %7 : vector<1x128xf32> to vector<8x128xf32>
    %197 = arith.addf %195, %196 : vector<8x128xf32>
    %198 = tpu.iota {dimensions = array<i32: 1>} : vector<8x128xi32>
    %199 = tpu.iota {dimensions = array<i32: 0>} : vector<8x128xi32>
    %c3_i32 = arith.constant 3 : i32
    %200 = vector.broadcast %c3_i32 : i32 to vector<8x128xi32>
    %201 = arith.cmpi slt, %198, %200 : vector<8x128xi32>
    %cst_70 = arith.constant -1.000000e+30 : f32
    %202 = vector.broadcast %cst_70 : f32 to vector<8x128xf32>
    %203 = arith.select %201, %197, %202 : vector<8x128xi1>, vector<8x128xf32>
    %cst_71 = arith.constant dense<0xFF800000> : vector<8xf32>
    %204 = vector.multi_reduction <maximumf>, %203, %cst_71 [1] : vector<8x128xf32> to vector<8xf32>
    %205 = vector.shape_cast %204 : vector<8xf32> to vector<8x1xf32>
    %206 = vector.broadcast %205 : vector<8x1xf32> to vector<8x128xf32>
    %207 = arith.subf %203, %206 : vector<8x128xf32>
    %208 = math.exp %207 : vector<8x128xf32>
    %cst_72 = arith.constant dense<0.000000e+00> : vector<8xf32>
    %209 = vector.multi_reduction <add>, %208, %cst_72 [1] : vector<8x128xf32> to vector<8xf32>
    %210 = vector.shape_cast %209 : vector<8xf32> to vector<8x1xf32>
    %211 = math.log %210 : vector<8x1xf32>
    %212 = arith.addf %205, %211 : vector<8x1xf32>
    %cst_73 = arith.constant 0.000000e+00 : f32
    %213 = vector.broadcast %cst_73 : f32 to vector<8x128xf32>
    %c0_i32 = arith.constant 0 : i32
    %214 = vector.broadcast %c0_i32 : i32 to vector<8x128xi32>
    %215 = arith.cmpi eq, %199, %214 : vector<8x128xi32>
    %c0_74 = arith.constant 0 : index
    %216 = memref.load %arg5[%c0_74] : memref<2xi32, #tpu.memory_space<smem>>
    %217 = vector.broadcast %216 : i32 to vector<8x128xi32>
    %218 = arith.cmpi eq, %198, %217 : vector<8x128xi32>
    %219 = arith.andi %215, %218 : vector<8x128xi1>
    %cst_75 = arith.constant 1.000000e+00 : f32
    %cst_76 = arith.constant 0.000000e+00 : f32
    %220 = vector.broadcast %cst_75 : f32 to vector<8x128xf32>
    %221 = vector.broadcast %cst_76 : f32 to vector<8x128xf32>
    %222 = arith.select %219, %220, %221 : vector<8x128xi1>, vector<8x128xf32>
    %223 = arith.addf %213, %222 : vector<8x128xf32>
    %c1_i32 = arith.constant 1 : i32
    %224 = vector.broadcast %c1_i32 : i32 to vector<8x128xi32>
    %225 = arith.cmpi eq, %199, %224 : vector<8x128xi32>
    %c1_77 = arith.constant 1 : index
    %226 = memref.load %arg5[%c1_77] : memref<2xi32, #tpu.memory_space<smem>>
    %227 = vector.broadcast %226 : i32 to vector<8x128xi32>
    %228 = arith.cmpi eq, %198, %227 : vector<8x128xi32>
    %229 = arith.andi %225, %228 : vector<8x128xi1>
    %cst_78 = arith.constant 1.000000e+00 : f32
    %cst_79 = arith.constant 0.000000e+00 : f32
    %230 = vector.broadcast %cst_78 : f32 to vector<8x128xf32>
    %231 = vector.broadcast %cst_79 : f32 to vector<8x128xf32>
    %232 = arith.select %229, %230, %231 : vector<8x128xi1>, vector<8x128xf32>
    %233 = arith.addf %223, %232 : vector<8x128xf32>
    %234 = arith.mulf %233, %197 : vector<8x128xf32>
    %cst_80 = arith.constant dense<0.000000e+00> : vector<8xf32>
    %235 = vector.multi_reduction <add>, %234, %cst_80 [1] : vector<8x128xf32> to vector<8xf32>
    %236 = vector.shape_cast %235 : vector<8xf32> to vector<8x1xf32>
    %237 = tpu.iota {dimensions = array<i32: 0>} : vector<8x1xi32>
    %c2_i32 = arith.constant 2 : i32
    %238 = vector.broadcast %c2_i32 : i32 to vector<8x1xi32>
    %239 = arith.cmpi slt, %237, %238 : vector<8x1xi32>
    %240 = arith.subf %212, %236 : vector<8x1xf32>
    %cst_81 = arith.constant 0.000000e+00 : f32
    %241 = vector.broadcast %cst_81 : f32 to vector<8x1xf32>
    %242 = arith.select %239, %240, %241 : vector<8x1xi1>, vector<8x1xf32>
    %cst_82 = arith.constant dense<0.000000e+00> : vector<1xf32>
    %243 = vector.multi_reduction <add>, %242, %cst_82 [0] : vector<8x1xf32> to vector<1xf32>
    %244 = vector.shape_cast %243 : vector<1xf32> to vector<1x1xf32>
    %cst_83 = arith.constant 2.000000e+00 : f32
    %245 = vector.broadcast %cst_83 : f32 to vector<1x1xf32>
    %246 = arith.divf %244, %245 : vector<1x1xf32>
    %c0_84 = arith.constant 0 : index
    %c0_85 = arith.constant 0 : index
    %247 = memref.load %arg6[%c0_84, %c0_85] : memref<1x1xf32, #tpu.memory_space<smem>>
    %248 = vector.broadcast %247 : f32 to vector<1x1xf32>
    %249 = arith.mulf %248, %191 : vector<1x1xf32>
    %cst_86 = arith.constant 1.000000e+00 : f32
    %250 = arith.subf %cst_86, %247 : f32
    %251 = vector.broadcast %250 : f32 to vector<1x1xf32>
    %252 = arith.mulf %251, %246 : vector<1x1xf32>
    %253 = arith.addf %249, %252 : vector<1x1xf32>
    %254 = tpu.iota {dimensions = array<i32: 1>} : vector<1x128xi32>
    %c0_i32_87 = arith.constant 0 : i32
    %255 = vector.broadcast %c0_i32_87 : i32 to vector<1x128xi32>
    %256 = arith.cmpi eq, %254, %255 : vector<1x128xi32>
    %c1_i32_88 = arith.constant 1 : i32
    %257 = vector.broadcast %c1_i32_88 : i32 to vector<1x128xi32>
    %258 = arith.cmpi eq, %254, %257 : vector<1x128xi32>
    %c2_i32_89 = arith.constant 2 : i32
    %259 = vector.broadcast %c2_i32_89 : i32 to vector<1x128xi32>
    %260 = arith.cmpi eq, %254, %259 : vector<1x128xi32>
    %cst_90 = arith.constant 0.000000e+00 : f32
    %261 = vector.shape_cast %191 : vector<1x1xf32> to vector<1x1xf32>
    %262 = vector.broadcast %261 : vector<1x1xf32> to vector<1x128xf32>
    %263 = vector.broadcast %cst_90 : f32 to vector<1x128xf32>
    %264 = arith.select %260, %262, %263 : vector<1x128xi1>, vector<1x128xf32>
    %265 = vector.shape_cast %246 : vector<1x1xf32> to vector<1x1xf32>
    %266 = vector.broadcast %265 : vector<1x1xf32> to vector<1x128xf32>
    %267 = arith.select %258, %266, %264 : vector<1x128xi1>, vector<1x128xf32>
    %268 = vector.shape_cast %253 : vector<1x1xf32> to vector<1x1xf32>
    %269 = vector.broadcast %268 : vector<1x1xf32> to vector<1x128xf32>
    %270 = arith.select %256, %269, %267 : vector<1x128xi1>, vector<1x128xf32>
    %c7_i32 = arith.constant 7 : i32
    %271 = vector.broadcast %c7_i32 : i32 to vector<8x128xi32>
    %272 = arith.cmpi eq, %199, %271 : vector<8x128xi32>
    %273 = vector.shape_cast %270 : vector<1x128xf32> to vector<1x128xf32>
    %274 = vector.broadcast %273 : vector<1x128xf32> to vector<8x128xf32>
    %275 = arith.select %272, %274, %197 : vector<8x128xi1>, vector<8x128xf32>
    %c0_91 = arith.constant 0 : index
    %c0_92 = arith.constant 0 : index
    %276 = vector.load %arg7[%c0_91, %c0_92] : memref<8x128xf32, #tpu.memory_space<vmem>>, vector<8x128xf32>
    tpu.vector_store %arg7[%c0_91, %c0_92], %275 {strides = array<i32>} : memref<8x128xf32, #tpu.memory_space<vmem>>, vector<8x128xf32>,
    return
  }
}

</mosaic_0001>

<bundles_post_ra>
// kernel: wmcl_hn_forward.1
= control target key start
LH: loop header
LB: loop body
LE: loop exit
PB: predicated region body
PF: predicated region fallthrough
CT: control target
= control target key end

     0   :  { %13 = vsyncpa [#allocation4], 0  ;;  %s1611_s27 = smov [#allocation3]   ;;  %s2110_s0 = inlined_call_operand.vmem [shape: bf16[512,72], index: 0, kind: input, shape index: {}]   ;;  %s2111_s1 = inlined_call_operand.vmem [shape: bf16[2,512], index: 1, kind: input, shape index: {}]   ;;  %s2112_s2 = inlined_call_operand.vmem [shape: bf16[2,8], index: 2, kind: input, shape index: {}]   ;;  %s2113_s3 = inlined_call_operand.vmem [shape: bf16[256,128], index: 3, kind: input, shape index: {}]   ;;  %s2114_s4 = inlined_call_operand.vmem [shape: f32[4,128], index: 4, kind: input, shape index: {}]   ;;  %s2115_s5 = inlined_call_operand.vmem [shape: s32[2], index: 5, kind: input, shape index: {}]   ;;  %s2116_s6 = inlined_call_operand.<no memory space> [shape: f32[1,1], index: 6, kind: input, shape index: {}]   ;;  %s2117_s7 = inlined_call_operand.vmem [shape: f32[8,128], index: 7, kind: output, shape index: {}]  }
   0x1   :  { %s29_s26 = sshll.u32 %s2115_s5, 4  ;;  %s30_s26 = int_to_ptr.vmem [resolvable:$true] %s29_s26 }
   0x2   :  { %32 = dma.vmem_to_smem %s30_s26, 16, %s1611_s27, [#allocation4]  }
   0x3   :  { %1609 = dma.done.wait [#allocation4], 16  }
   0x4   :  { %1610 = vsyncadd [#allocation4], 4294967280 }
   0x5   :  { %39 = sfence }
   0x6   :  { %v49_v0 = vld [vmem:[%s2113_s3 + $0x20] sm:$0xf]  ;;  %vm424_vm0 = vcmask 1043456   ;;  %v1490_v4 = vld [vmem:[%s2113_s3 + $0x18] sm:$0xff]  ;;  %v1489_v5 = vld [vmem:[%s2113_s3 + $0x10] sm:$0xff]  ;;  %vm327_vm1 = vcmask 588800  }
   0x7   :  { %v317_v1 = vunpack.c.l.b16 %v49_v0  ;;  %v1488_v6 = vld [vmem:[%s2113_s3 + $0x8] sm:$0xff]  ;;  %v1487_v7 = vld [vmem:[%s2113_s3] sm:$0xff]  ;;  %v1524_v10 = vld [vmem:[%s2110_s0 + $0xb8] sm:$0xff]  ;;  %vm758_vm2 = vcmask 64512   ;;  %s1612_s21 = smov 32   ;;  %vm786_vm3 = vcmask 261120  }
   0x8   :  { %v1501_v8 = vld [vmem:[%s2110_s0] sm:$0xff]  ;;  %v1502_v11 = vld [vmem:[%s2110_s0 + $0x8] sm:$0xff]  ;;  %v1503_v14 = vld [vmem:[%s2110_s0 + $0x10] sm:$0xff]  ;;  %vm815_vm4 = vcmask 523264   ;;  %s1613_s24 = smov 64   ;;  %s1614_s25 = smov 96  }
   0x9   :  { %v322_v2 = vpack.c.b16 %v317_v1, %v317_v1  ;;  %v1513_v9 = vld [vmem:[%s2110_s0 + $0x60] sm:$0xff]  ;;  %v1514_v12 = vld [vmem:[%s2110_s0 + $0x68] sm:$0xff]  ;;  %v1515_v15 = vld [vmem:[%s2110_s0 + $0x70] sm:$0xff]  ;;  %vm832_vm5 = vcmask 254976   ;;  %vm1146_vm15 = vcmask 1040384   ;;  %s1486_s12 = sld [smem:[#allocation3 + $0x1]] }
   0xa   :  { %v1525_v13 = vld [vmem:[%s2110_s0 + $0xc0] sm:$0xff]  ;;  %v1526_v16 = vld [vmem:[%s2110_s0 + $0xc8] sm:$0xff]  ;;  %v1504_v17 = vld [vmem:[%s2110_s0 + $0x18] sm:$0xff] }
   0xb   :  { %v426_v3 = vsel %vm424_vm0, %v322_v2, 0  ;;  %v1516_v18 = vld [vmem:[%s2110_s0 + $0x78] sm:$0xff]  ;;  %v1527_v19 = vld [vmem:[%s2110_s0 + $0xd0] sm:$0xff]  ;;  %v1505_v21 = vld [vmem:[%s2110_s0 + $0x20] sm:$0xff] }
   0xc   :  { %431 = vmatpush.bf16.msra.mxu0 %v426_v3  ;;  %1533 = vmatpush.bf16.msra.mxu1 %v426_v3  ;;  %v1520_v20 = vld [vmem:[%s2110_s0 + $0x98] sm:$0xff]  ;;  %v1521_v23 = vld [vmem:[%s2110_s0 + $0xa0] sm:$0xff]  ;;  %v1506_v24 = vld [vmem:[%s2110_s0 + $0x28] sm:$0xff] }
   0xd   :  { %1535 = vmatpush.bf16.msra.mxu3 %v426_v3  ;;  %1534 = vmatpush.bf16.msra.mxu2 %v426_v3  ;;  %v1528_v22 = vld [vmem:[%s2110_s0 + $0xd8] sm:$0xff]  ;;  %v1529_v25 = vld [vmem:[%s2110_s0 + $0xe0] sm:$0xff]  ;;  %v1507_v26 = vld [vmem:[%s2110_s0 + $0x30] sm:$0xff] }
   0xe   :  { %v1530_v27 = vld [vmem:[%s2110_s0 + $0xe8] sm:$0xff]  ;;  %v1508_v29 = vld [vmem:[%s2110_s0 + $0x38] sm:$0xff]  ;;  %v1531_v30 = vld [vmem:[%s2110_s0 + $0xf0] sm:$0xff] }
   0xf   :  { %v1522_v28 = vld [vmem:[%s2110_s0 + $0xa8] sm:$0xff]  ;;  %v1523_v31 = vld [vmem:[%s2110_s0 + $0xb0] sm:$0xff]  ;;  %v1517_v32 = vld [vmem:[%s2110_s0 + $0x80] sm:$0xff] }
  0x10   :  { %432 = vmatpush.bf16.msra.mxu0 %v1490_v4  ;;  %1536 = vmatpush.bf16.msra.mxu1 %v1490_v4  ;;  %v1509_v33 = vld [vmem:[%s2110_s0 + $0x40] sm:$0xff]  ;;  %v1532_v36 = vld [vmem:[%s2110_s0 + $0xf8] sm:$0xff]  ;;  %v1518_v40 = vld [vmem:[%s2110_s0 + $0x88] sm:$0xff] }
  0x11   :  { %1538 = vmatpush.bf16.msra.mxu3 %v1490_v4  ;;  %1537 = vmatpush.bf16.msra.mxu2 %v1490_v4  ;;  %v1788_v37 = vld [vmem:[%s2114_s4] ss:$0 sm:$0xff]  ;;  %v1510_v47 = vld [vmem:[%s2110_s0 + $0x48] sm:$0xff]  ;;  %v1519_v53 = vld [vmem:[%s2110_s0 + $0x90] sm:$0xff] }
  0x12   :  { %v1511_v61 = vld [vmem:[%s2110_s0 + $0x50] sm:$0xff] }
  0x14   :  { %433 = vmatpush.bf16.msra.mxu0 %v1489_v5  ;;  %1539 = vmatpush.bf16.msra.mxu1 %v1489_v5 }
  0x15   :  { %1541 = vmatpush.bf16.msra.mxu3 %v1489_v5  ;;  %1540 = vmatpush.bf16.msra.mxu2 %v1489_v5 }
  0x18   :  { %434 = vmatpush.bf16.msra.mxu0 %v1488_v6  ;;  %1542 = vmatpush.bf16.msra.mxu1 %v1488_v6 }
  0x19   :  { %1544 = vmatpush.bf16.msra.mxu3 %v1488_v6  ;;  %1543 = vmatpush.bf16.msra.mxu2 %v1488_v6 }
  0x1c   :  { %435 = vmatpush.bf16.msra.mxu0 %v1487_v7  ;;  %1545 = vmatpush.bf16.msra.mxu1 %v1487_v7 }
  0x1d   :  { %1547 = vmatpush.bf16.msra.mxu3 %v1487_v7  ;;  %1546 = vmatpush.bf16.msra.mxu2 %v1487_v7 }
  0x1f   :  { %1407 = vmatmul.msk.bf16.vlgmr.msra.gmra.mxu0 %vm327_vm1, %v1501_v8  ;;  %1419 = vmatmul.msk.bf16.vlgmr.msra.gmra.mxu1 %vm327_vm1, %v1513_v9 }
  0x20   :  { %1430 = vmatmul.msk.bf16.vlgmr.msra.gmra.mxu3 %vm327_vm1, %v1524_v10  ;;  %1426 = vmatmul.msk.bf16.vlgmr.msra.gmra.mxu2 %vm327_vm1, %v1520_v20 }
  0x2f   :  { %1408 = vmatmul.msk.bf16.gmra.mxu0 %vm327_vm1, %v1502_v11  ;;  %1420 = vmatmul.msk.bf16.gmra.mxu1 %vm327_vm1, %v1514_v12 }
  0x30   :  { %1431 = vmatmul.msk.bf16.gmra.mxu3 %vm327_vm1, %v1525_v13  ;;  %1427 = vmatmul.msk.bf16.gmra.mxu2 %vm327_vm1, %v1521_v23 }
  0x3f   :  { %1409 = vmatmul.msk.bf16.gmra.mxu0 %vm327_vm1, %v1503_v14  ;;  %1421 = vmatmul.msk.bf16.gmra.mxu1 %vm327_vm1, %v1515_v15  ;;  %v1512_v14 = vld [vmem:[%s2110_s0 + $0x58] sm:$0xff] }
  0x40   :  { %1432 = vmatmul.msk.bf16.gmra.mxu3 %vm327_vm1, %v1526_v16  ;;  %1428 = vmatmul.msk.bf16.gmra.mxu2 %vm327_vm1, %v1522_v28 }
  0x4f   :  { %1410 = vmatmul.msk.bf16.gmra.mxu0 %vm327_vm1, %v1504_v17  ;;  %1422 = vmatmul.msk.bf16.gmra.mxu1 %vm327_vm1, %v1516_v18 }
  0x50   :  { %1433 = vmatmul.msk.bf16.gmra.mxu3 %vm327_vm1, %v1527_v19  ;;  %1429 = vmatmul.msk.bf16.gmra.mxu2 %vm327_vm1, %v1523_v31 }
  0x5f   :  { %1411 = vmatmul.msk.bf16.gmra.mxu0 %vm327_vm1, %v1505_v21  ;;  %1423 = vmatmul.msk.bf16.gmra.mxu1 %vm327_vm1, %v1517_v32 }
  0x60   :  { %1434 = vmatmul.msk.bf16.gmra.mxu3 %vm327_vm1, %v1528_v22 }
  0x6f   :  { %1412 = vmatmul.msk.bf16.gmra.mxu0 %vm327_vm1, %v1506_v24  ;;  %1424 = vmatmul.msk.bf16.gmra.mxu1 %vm327_vm1, %v1518_v40 }
  0x70   :  { %1435 = vmatmul.msk.bf16.gmra.mxu3 %vm327_vm1, %v1529_v25 }
  0x7f   :  { %1413 = vmatmul.msk.bf16.gmra.mxu0 %vm327_vm1, %v1507_v26  ;;  %1425 = vmatmul.msk.bf16.gmra.mxu1 %vm327_vm1, %v1519_v53 }
  0x80   :  { %1436 = vmatmul.msk.bf16.gmra.mxu3 %vm327_vm1, %v1530_v27 }
  0x8f   :  { %1414 = vmatmul.msk.bf16.gmra.mxu0 %vm327_vm1, %v1508_v29 }
  0x90   :  { %1437 = vmatmul.msk.bf16.gmra.mxu3 %vm327_vm1, %v1531_v30 }
  0x9c   :  { %v437_v34 = vpop.f32.mrf.mxu0  ;;  %v1780_v35 = vpop.f32.mrf.mxu1 }
  0x9d   :  { %v438_v38 = vadd.f32 %v1788_v37, %v437_v34 }
  0x9f   :  { %1415 = vmatmul.msk.bf16.gmra.mxu0 %vm327_vm1, %v1509_v33  ;;  %v597_v44 = vmax.f32 %v438_v38, 0.0 }
  0xa0   :  { %1438 = vmatmul.msk.bf16.gmra.mxu3 %vm327_vm1, %v1532_v36 }
  0xa3   :  { %v1793_v39 = vpop.f32.mrf.mxu3 }
  0xa4   :  { %v439_v41 = vpop.f32.mrf.mxu0  ;;  %v1798_v42 = vpop.f32.mrf.mxu1 }
  0xa5   :  { %v440_v43 = vadd.f32 %v1788_v37, %v439_v41 }
  0xa7   :  { %v598_v45 = vmax.f32 %v440_v43, 0.0 }
  0xa9   :  { %v1802_v46 = vpack.c.bf16 %v598_v45, %v597_v44 }
  0xab   :  { %v1807_v48 = vpop.f32.mrf.mxu3 }
  0xac   :  { %v442_v49 = vpop.f32.mrf.mxu0  ;;  %v502_v50 = vpop.f32.mrf.mxu1 }
  0xad   :  { %v443_v51 = vadd.f32 %v1788_v37, %v442_v49  ;;  %v503_v32 = vadd.f32 %v1788_v37, %v502_v50  ;;  %v500_v49 = vadd.f32 %v1788_v37, %v1798_v42 }
  0xaf   :  { %1416 = vmatmul.msk.bf16.gmra.mxu0 %vm327_vm1, %v1510_v47  ;;  %v599_v57 = vmax.f32 %v443_v51, 0.0  ;;  %v498_v47 = vadd.f32 %v1788_v37, %v1780_v35  ;;  %v623_v51 = vmax.f32 %v503_v32, 0.0  ;;  %v555_v32 = vadd.f32 %v1788_v37, %v1807_v48 }
  0xb3   :  { %v557_v52 = vpop.f32.mrf.mxu3 }
  0xb4   :  { %v444_v54 = vpop.f32.mrf.mxu0  ;;  %v504_v55 = vpop.f32.mrf.mxu1  ;;  %v558_v59 = vadd.f32 %v1788_v37, %v557_v52 }
  0xb5   :  { %v445_v56 = vadd.f32 %v1788_v37, %v444_v54  ;;  %v505_v33 = vadd.f32 %v1788_v37, %v504_v55 }
  0xb6   :  { %v645_v0 = vmax.f32 %v558_v59, 0.0  ;;  %v622_v59 = vmax.f32 %v500_v49, 0.0 }
  0xb7   :  { %v600_v58 = vmax.f32 %v445_v56, 0.0  ;;  %v624_v50 = vmax.f32 %v505_v33, 0.0 }
  0xb9   :  { %v1817_v60 = vpack.c.bf16 %v600_v58, %v599_v57  ;;  %v621_v58 = vmax.f32 %v498_v47, 0.0 }
  0xbb   :  { %v559_v62 = vpop.f32.mrf.mxu3 }
  0xbc   :  { %v447_v63 = vpop.f32.mrf.mxu0  ;;  %v560_v1 = vadd.f32 %v1788_v37, %v559_v62  ;;  %v507_v2 = vpop.f32.mrf.mxu1 }
  0xbd   :  { %v448_v5 = vadd.f32 %v1788_v37, %v447_v63  ;;  %v508_v23 = vadd.f32 %v1788_v37, %v507_v2  ;;  %v1856_v62 = vpop.f32.mrf.mxu2  ;;  %v674_v63 = vpack.c.bf16 %v622_v59, %v621_v58 }
  0xbe   :  { %v646_v3 = vmax.f32 %v560_v1, 0.0 }
  0xbf   :  { %1417 = vmatmul.msk.bf16.gmra.mxu0 %vm327_vm1, %v1511_v61  ;;  %v601_v10 = vmax.f32 %v448_v5, 0.0  ;;  %v625_v34 = vmax.f32 %v508_v23, 0.0  ;;  %v675_v61 = vpack.c.bf16 %v624_v50, %v623_v51  ;;  %v644_v51 = vmax.f32 %v555_v32, 0.0 }
  0xc0   :  { %v1824_v4 = vpack.c.bf16 %v646_v3, %v645_v0 }
  0xc3   :  { %v562_v6 = vpop.f32.mrf.mxu3 }
  0xc4   :  { %v449_v7 = vpop.f32.mrf.mxu0  ;;  %v509_v8 = vpop.f32.mrf.mxu1  ;;  %v563_v12 = vadd.f32 %v1788_v37, %v562_v6 }
  0xc5   :  { %v450_v9 = vadd.f32 %v1788_v37, %v449_v7  ;;  %v510_v25 = vadd.f32 %v1788_v37, %v509_v8  ;;  %v1860_v1 = vpop.f32.mrf.mxu2 }
  0xc6   :  { %v647_v17 = vmax.f32 %v563_v12, 0.0 }
  0xc7   :  { %v602_v11 = vmax.f32 %v450_v9, 0.0  ;;  %v626_v40 = vmax.f32 %v510_v25, 0.0 }
  0xc9   :  { %v1829_v13 = vpack.c.bf16 %v602_v11, %v601_v10  ;;  %v676_v53 = vpack.c.bf16 %v626_v40, %v625_v34 }
  0xcb   :  { %v564_v15 = vpop.f32.mrf.mxu3 }
  0xcc   :  { %v452_v16 = vpop.f32.mrf.mxu0  ;;  %v565_v18 = vadd.f32 %v1788_v37, %v564_v15  ;;  %v512_v19 = vpop.f32.mrf.mxu1 }
  0xcd   :  { %v513_v22 = vadd.f32 %v1788_v37, %v512_v19  ;;  %v453_v24 = vadd.f32 %v1788_v37, %v452_v16  ;;  %v537_v10 = vpop.f32.mrf.mxu2 }
  0xce   :  { %v648_v20 = vmax.f32 %v565_v18, 0.0 }
  0xcf   :  { %1418 = vmatmul.msk.bf16.gmra.mxu0 %vm327_vm1, %v1512_v14  ;;  %v627_v30 = vmax.f32 %v513_v22, 0.0  ;;  %v603_v36 = vmax.f32 %v453_v24, 0.0 }
  0xd0   :  { %v1836_v21 = vpack.c.bf16 %v648_v20, %v647_v17 }
  0xd3   :  { %v567_v26 = vpop.f32.mrf.mxu3 }
  0xd4   :  { %v454_v27 = vpop.f32.mrf.mxu0  ;;  %v514_v28 = vpop.f32.mrf.mxu1  ;;  %v568_v43 = vadd.f32 %v1788_v37, %v567_v26 }
  0xd5   :  { %v455_v29 = vadd.f32 %v1788_v37, %v454_v27  ;;  %v515_v31 = vadd.f32 %v1788_v37, %v514_v28  ;;  %v539_v14 = vpop.f32.mrf.mxu2 }
  0xd6   :  { %v649_v55 = vmax.f32 %v568_v43, 0.0 }
  0xd7   :  { %v604_v38 = vmax.f32 %v455_v29, 0.0  ;;  %v628_v41 = vmax.f32 %v515_v31, 0.0  ;;  %v553_v31 = vadd.f32 %v1788_v37, %v1793_v39 }
  0xd9   :  { %v677_v44 = vpack.c.bf16 %v628_v41, %v627_v30  ;;  %v1847_v45 = vpack.c.bf16 %v604_v38, %v603_v36  ;;  %v643_v49 = vmax.f32 %v553_v31, 0.0 }
  0xdb   :  { %v569_v52 = vpop.f32.mrf.mxu3  ;;  %717 = vmatpush.bf16.msrb.mxu2 %v677_v44 }
  0xdc   :  { %v1853_v54 = vpop.f32.mrf.mxu0  ;;  %v570_v56 = vadd.f32 %v1788_v37, %v569_v52  ;;  %v1874_v24 = vpop.f32.mrf.mxu1 }
  0xdd   :  { %v542_v19 = vpop.f32.mrf.mxu2  ;;  %v458_v59 = vadd.f32 %v1788_v37, %v1853_v54 }
  0xde   :  { %v650_v57 = vmax.f32 %v570_v56, 0.0 }
  0xdf   :  { %718 = vmatpush.bf16.msrb.mxu2 %v676_v53 }
  0xe0   :  { %v1858_v35 = vpack.c.bf16 %v650_v57, %v649_v55 }
  0xe3   :  { %v572_v42 = vpop.f32.mrf.mxu3  ;;  %719 = vmatpush.bf16.msrb.mxu2 %v675_v61 }
  0xe4   :  { %v459_v0 = vpop.f32.mrf.mxu0  ;;  %v573_v2 = vadd.f32 %v1788_v37, %v572_v42  ;;  %v1889_v47 = vpop.f32.mrf.mxu1  ;;  %v543_v42 = vadd.f32 %v1788_v37, %v542_v19 }
  0xe5   :  { %v544_v23 = vpop.f32.mrf.mxu2  ;;  %v460_v48 = vadd.f32 %v1788_v37, %v459_v0 }
  0xe6   :  { %v651_v6 = vmax.f32 %v573_v2, 0.0 }
  0xe7   :  { %720 = vmatpush.bf16.msrb.mxu2 %v674_v63  ;;  %v545_v63 = vadd.f32 %v1788_v37, %v544_v23  ;;  %v606_v0 = vmax.f32 %v460_v48, 0.0 }
  0xe9   :  { %v640_v54 = vmax.f32 %v545_v63, 0.0 }
  0xeb   :  { %v574_v3 = vpop.f32.mrf.mxu3 }
  0xec   :  { %v462_v5 = vpop.f32.mrf.mxu0  ;;  %v575_v7 = vadd.f32 %v1788_v37, %v574_v3  ;;  %v685_v3 = vpack.c.bf16 %v644_v51, %v643_v49 }
  0xed   :  { %v547_v28 = vpop.f32.mrf.mxu2  ;;  %v463_v44 = vadd.f32 %v1788_v37, %v462_v5  ;;  %v538_v5 = vadd.f32 %v1788_v37, %v537_v10  ;;  %v533_v10 = vadd.f32 %v1788_v37, %v1856_v62 }
  0xee   :  { %v652_v8 = vmax.f32 %v575_v7, 0.0  ;;  %v548_v43 = vadd.f32 %v1788_v37, %v547_v28  ;;  %730 = vmatpush.bf16.msrb.mxu3 %v685_v3  ;;  %v520_v3 = vadd.f32 %v1788_v37, %v1889_v47 }
  0xef   :  { %v607_v61 = vmax.f32 %v463_v44, 0.0  ;;  %v637_v19 = vmax.f32 %v538_v5, 0.0  ;;  %v635_v31 = vmax.f32 %v533_v10, 0.0 }
  0xf0   :  { %v1864_v9 = vpack.c.bf16 %v652_v8, %v651_v6  ;;  %v641_v57 = vmax.f32 %v548_v43, 0.0  ;;  %v540_v6 = vadd.f32 %v1788_v37, %v539_v14  ;;  %v535_v14 = vadd.f32 %v1788_v37, %v1860_v1 }
  0xf2   :  { %v638_v23 = vmax.f32 %v540_v6, 0.0  ;;  %v636_v32 = vmax.f32 %v535_v14, 0.0 }
  0xf3   :  { %v1866_v11 = vpop.f32.mrf.mxu3 }
  0xf4   :  { %v464_v12 = vpop.f32.mrf.mxu0  ;;  %v681_v62 = vpack.c.bf16 %v636_v32, %v635_v31 }
  0xf5   :  { %v465_v38 = vadd.f32 %v1788_v37, %v464_v12  ;;  %v549_v53 = vpop.f32.mrf.mxu2  ;;  %v522_v12 = vpop.f32.mrf.mxu1 }
  0xf6   :  { %v550_v58 = vadd.f32 %v1788_v37, %v549_v53 }
  0xf7   :  { %v608_v55 = vmax.f32 %v465_v38, 0.0 }
  0xf8   :  { %v642_v2 = vmax.f32 %v550_v58, 0.0 }
  0xf9   :  { %v667_v7 = vpack.c.bf16 %v608_v55, %v607_v61 }
  0xfa   :  { %v684_v8 = vpack.c.bf16 %v642_v2, %v641_v57  ;;  %v518_v2 = vadd.f32 %v1788_v37, %v1874_v24 }
  0xfb   :  { %v1868_v15 = vpop.f32.mrf.mxu3 }
  0xfc   :  { %v467_v16 = vpop.f32.mrf.mxu0  ;;  %731 = vmatpush.bf16.msrb.mxu3 %v684_v8  ;;  %v580_v53 = vadd.f32 %v1788_v37, %v1868_v15  ;;  %v629_v8 = vmax.f32 %v518_v2, 0.0 }
  0xfd   :  { %v468_v33 = vadd.f32 %v1788_v37, %v467_v16  ;;  %v605_v16 = vmax.f32 %v458_v59, 0.0 }
  0xfe   :  { %v654_v61 = vmax.f32 %v580_v53, 0.0 }
  0xff   :  { %v609_v39 = vmax.f32 %v468_v33, 0.0 }
 0x103   :  { %v1870_v17 = vpop.f32.mrf.mxu3 }
 0x104   :  { %v469_v18 = vpop.f32.mrf.mxu0  ;;  %v583_v44 = vadd.f32 %v1788_v37, %v1870_v17 }
 0x105   :  { %v470_v29 = vadd.f32 %v1788_v37, %v469_v18  ;;  %v639_v18 = vmax.f32 %v543_v42, 0.0 }
 0x106   :  { %v655_v17 = vmax.f32 %v583_v44, 0.0 }
 0x107   :  { %v610_v40 = vmax.f32 %v470_v29, 0.0  ;;  %v683_v28 = vpack.c.bf16 %v640_v54, %v639_v18  ;;  %v682_v29 = vpack.c.bf16 %v638_v23, %v637_v19 }
 0x109   :  { %v668_v56 = vpack.c.bf16 %v610_v40, %v609_v39  ;;  %732 = vmatpush.bf16.msrb.mxu3 %v683_v28 }
 0x10b   :  { %v1872_v20 = vpop.f32.mrf.mxu3 }
 0x10c   :  { %v472_v22 = vpop.f32.mrf.mxu0  ;;  %v585_v49 = vadd.f32 %v1788_v37, %v1872_v20  ;;  %v523_v20 = vadd.f32 %v1788_v37, %v522_v12  ;;  %v630_v12 = vmax.f32 %v520_v3, 0.0 }
 0x10d   :  { %v473_v25 = vadd.f32 %v1788_v37, %v472_v22  ;;  %733 = vmatpush.bf16.msrb.mxu3 %v682_v29 }
 0x10e   :  { %v656_v55 = vmax.f32 %v585_v49, 0.0 }
 0x10f   :  { %v611_v34 = vmax.f32 %v473_v25, 0.0 }
 0x110   :  { %v691_v42 = vpack.c.bf16 %v656_v55, %v655_v17  ;;  %v1492_v17 = vld [vmem:[%s2113_s3 + $0x38] sm:$0xff] }
 0x111   :  { %734 = vmatpush.bf16.msrb.mxu3 %v681_v62 }
 0x113   :  { %v1877_v26 = vpop.f32.mrf.mxu3 }
 0x114   :  { %v474_v27 = vpop.f32.mrf.mxu0  ;;  %v588_v1 = vadd.f32 %v1788_v37, %v1877_v26  ;;  %v578_v26 = vadd.f32 %v1788_v37, %v1866_v11 }
 0x115   :  { %v475_v30 = vadd.f32 %v1788_v37, %v474_v27  ;;  %v666_v27 = vpack.c.bf16 %v606_v0, %v605_v16  ;;  %v631_v0 = vmax.f32 %v523_v20, 0.0 }
 0x116   :  { %v657_v51 = vmax.f32 %v588_v1, 0.0  ;;  %v653_v11 = vmax.f32 %v578_v26, 0.0  ;;  %v1493_v26 = vld [vmem:[%s2113_s3 + $0x40] sm:$0xff] }
 0x117   :  { %v612_v36 = vmax.f32 %v475_v30, 0.0  ;;  %v524_v30 = vpop.f32.mrf.mxu1 }
 0x118   :  { %v525_v57 = vadd.f32 %v1788_v37, %v524_v30 }
 0x119   :  { %v669_v41 = vpack.c.bf16 %v612_v36, %v611_v34 }
 0x11a   :  { %v632_v5 = vmax.f32 %v525_v57, 0.0  ;;  %v1556_v57 = vld [vmem:[%s2114_s4 + $0x1] ss:$0 sm:$0xff] }
 0x11b   :  { %704 = vmatpush.bf16.msrb.mxu1 %v669_v41  ;;  %v589_v50 = vpop.f32.mrf.mxu3 }
 0x11c   :  { %v1892_v52 = vpop.f32.mrf.mxu0  ;;  %v590_v40 = vadd.f32 %v1788_v37, %v589_v50  ;;  %v679_v18 = vpack.c.bf16 %v632_v5, %v631_v0  ;;  %v1557_v0 = vld [vmem:[%s2114_s4 + $0x2] ss:$0 sm:$0xff] }
 0x11e   :  { %v658_v39 = vmax.f32 %v590_v40, 0.0 }
 0x11f   :  { %705 = vmatpush.bf16.msrb.mxu1 %v668_v56 }
 0x123   :  { %706 = vmatpush.bf16.msrb.mxu1 %v667_v7  ;;  %v592_v22 = vpop.f32.mrf.mxu3  ;;  %v690_v7 = vpack.c.bf16 %v654_v61, %v653_v11 }
 0x124   :  { %v1901_v25 = vpop.f32.mrf.mxu0  ;;  %v593_v36 = vadd.f32 %v1788_v37, %v592_v22  ;;  %v678_v22 = vpack.c.bf16 %v630_v12, %v629_v8 }
 0x126   :  { %v659_v41 = vmax.f32 %v593_v36, 0.0 }
 0x127   :  { %707 = vmatpush.bf16.msrb.mxu1 %v666_v27 }
 0x12b   :  { %708 = vmatpush.bf16.msrb.mxu1 %v1847_v45  ;;  %v594_v33 = vpop.f32.mrf.mxu3  ;;  %v527_v45 = vpop.f32.mrf.mxu1 }
 0x12c   :  { %v1908_v34 = vpop.f32.mrf.mxu0  ;;  %v595_v38 = vadd.f32 %v1788_v37, %v594_v33  ;;  %v528_v50 = vadd.f32 %v1788_v37, %v527_v45 }
 0x12e   :  { %v660_v43 = vmax.f32 %v595_v38, 0.0  ;;  %v633_v58 = vmax.f32 %v528_v50, 0.0  ;;  %v478_v38 = vadd.f32 %v1788_v37, %v1892_v52 }
 0x12f   :  { %709 = vmatpush.bf16.msrb.mxu1 %v1829_v13 }
 0x130   :  { %v693_v48 = vpack.c.bf16 %v660_v43, %v659_v41  ;;  %v50_v41 = vld [vmem:[%s2113_s3 + $0x28] sm:$0xf]  ;;  %v613_v43 = vmax.f32 %v478_v38, 0.0 }
 0x131   :  { %v763_v45 = vsel %vm424_vm0, %v50_v41, 0  ;;  %vm1187_vm0 = vcmask 785408  }
 0x133   :  { %710 = vmatpush.bf16.msrb.mxu1 %v1817_v60  ;;  %v692_v60 = vpack.c.bf16 %v658_v39, %v657_v51  ;;  %v529_v56 = vpop.f32.mrf.mxu1 }
 0x134   :  { %v484_v13 = vpop.f32.mrf.mxu0  ;;  %v530_v59 = vadd.f32 %v1788_v37, %v529_v56  ;;  %v1491_v56 = vld [vmem:[%s2113_s3 + $0x30] sm:$0xff] }
 0x136   :  { %v634_v63 = vmax.f32 %v530_v59, 0.0 }
 0x137   :  { %711 = vmatpush.bf16.msrb.mxu1 %v1802_v46  ;;  %v661_v46 = vld [vmem:[%s2111_s1] sm:$0xf] }
 0x138   :  { %695 = vst [vmem:[#allocation1] ss:$9 sm:$0xff] %v661_v46  ;;  %v680_v6 = vpack.c.bf16 %v634_v63, %v633_v58 }
 0x13a   :  { %735 = vmatpush.bf16.msrb.mxu3 %v680_v6 }
 0x13b   :  { %743 = vmatpush.bf16.msra.mxu1 %v693_v48  ;;  %v1494_v48 = vld [vmem:[%s2113_s3 + $0x48] sm:$0xff] }
 0x13c   :  { %v487_v15 = vpop.f32.mrf.mxu0 }
 0x13e   :  { %736 = vmatpush.bf16.msrb.mxu3 %v679_v18 }
 0x13f   :  { %744 = vmatpush.bf16.msra.mxu1 %v692_v60  ;;  %v696_v16 = vld [vmem:[#allocation1] sm:$0xff]  ;;  %v698_v24 = vld [vmem:[#allocation1 + $0x12] sm:$0xff] }
 0x140   :  { %712 = vmatmul.bf16.vlgmr.msrb.gmra.mxu1 %v696_v16  ;;  %v699_v27 = vld [vmem:[#allocation1 + $0x1b] sm:$0xff] }
 0x142   :  { %737 = vmatpush.bf16.msrb.mxu3 %v678_v22 }
 0x143   :  { %745 = vmatpush.bf16.msra.mxu1 %v691_v42 }
 0x144   :  { %v489_v54 = vpop.f32.mrf.mxu0 }
 0x145   :  { %738 = vmatmul.bf16.vlgmr.msrb.gmra.mxu3 %v698_v24  ;;  %v490_v10 = vadd.f32 %v1788_v37, %v489_v54 }
 0x146   :  { %822 = vmatpush.bf16.msra.mxu3 %v1494_v48 }
 0x147   :  { %746 = vmatpush.bf16.msra.mxu1 %v690_v7  ;;  %v618_v30 = vmax.f32 %v490_v10, 0.0 }
 0x14a   :  { %823 = vmatpush.bf16.msra.mxu3 %v1493_v26  ;;  %v1500_v26 = vld [vmem:[%s2113_s3 + $0x78] sm:$0xff] }
 0x14b   :  { %747 = vmatpush.bf16.msra.mxu1 %v1864_v9  ;;  %v488_v9 = vadd.f32 %v1788_v37, %v487_v15 }
 0x14c   :  { %v492_v47 = vpop.f32.mrf.mxu0 }
 0x14d   :  { %v493_v19 = vadd.f32 %v1788_v37, %v492_v47  ;;  %v617_v32 = vmax.f32 %v488_v9, 0.0 }
 0x14e   :  { %824 = vmatpush.bf16.msra.mxu3 %v1492_v17  ;;  %v1499_v17 = vld [vmem:[%s2113_s3 + $0x70] sm:$0xff] }
 0x14f   :  { %748 = vmatpush.bf16.msra.mxu1 %v1858_v35  ;;  %v619_v28 = vmax.f32 %v493_v19, 0.0  ;;  %v485_v35 = vadd.f32 %v1788_v37, %v484_v13  ;;  %v672_v36 = vpack.c.bf16 %v618_v30, %v617_v32 }
 0x151   :  { %v616_v33 = vmax.f32 %v485_v35, 0.0 }
 0x152   :  { %825 = vmatpush.bf16.msra.mxu3 %v1491_v56  ;;  %v1496_v56 = vld [vmem:[%s2113_s3 + $0x58] sm:$0xff] }
 0x153   :  { %749 = vmatpush.bf16.msra.mxu1 %v1836_v21  ;;  %v483_v21 = vadd.f32 %v1788_v37, %v1908_v34 }
 0x154   :  { %v494_v23 = vpop.f32.mrf.mxu0 }
 0x155   :  { %v495_v14 = vadd.f32 %v1788_v37, %v494_v23  ;;  %v615_v62 = vmax.f32 %v483_v21, 0.0 }
 0x157   :  { %750 = vmatpush.bf16.msra.mxu1 %v1824_v4  ;;  %v620_v29 = vmax.f32 %v495_v14, 0.0  ;;  %v480_v4 = vadd.f32 %v1788_v37, %v1901_v25  ;;  %v671_v40 = vpack.c.bf16 %v616_v33, %v615_v62  ;;  %v697_v25 = vld [vmem:[#allocation1 + $0x9] sm:$0xff]  ;;  %v756_v37 = vld [vmem:[%s2112_s2] sm:$0x1]  ;;  %s1245_s2 = ssub.f32 1.0, %s2116_s6 }
 0x159   :  { %v673_v31 = vpack.c.bf16 %v620_v29, %v619_v28  ;;  %v614_v1 = vmax.f32 %v480_v4, 0.0 }
 0x15a   :  { %751 = vmatmul.bf16.vlgmr.msra.gmra.mxu1 %v699_v27 }
 0x15b   :  { %721 = vmatpush.bf16.msrb.mxu2 %v673_v31  ;;  %v670_v34 = vpack.c.bf16 %v614_v1, %v613_v43 }
 0x15f   :  { %722 = vmatpush.bf16.msrb.mxu2 %v672_v36 }
 0x163   :  { %723 = vmatpush.bf16.msrb.mxu2 %v671_v40 }
 0x167   :  { %724 = vmatpush.bf16.msrb.mxu2 %v670_v34 }
 0x16a   :  { %725 = vmatmul.bf16.vlgmr.msrb.gmra.mxu2 %v697_v25 }
 0x16b   :  { %772 = vmatpush.bf16.msra.mxu2 %v763_v45 }
 0x17a   :  { %1439 = vmatmul.msk.bf16.vlgmr.msra.gmra.mxu2 %vm758_vm2, %v756_v37  ;;  %vm925_vm2 = vcmask 9216  }
 0x1bd   :  { %v713_v52 = vpop.f32.mrf.mxu1 }
 0x1c5   :  { %v715_v44 = vpop.f32.mrf.mxu1 }
 0x1c8   :  { %v739_v49 = vpop.f32.mrf.mxu3 }
 0x1d0   :  { %v741_v13 = vpop.f32.mrf.mxu3 }
 0x1d7   :  { %v752_v51 = vpop.f32.mrf.mxu1 }
 0x1df   :  { %v754_v39 = vpop.f32.mrf.mxu1 }
 0x1ed   :  { %v726_v50 = vpop.f32.mrf.mxu2 }
 0x1ee   :  { %v727_v53 = vadd.f32 %v726_v50, %v713_v52 }
 0x1f0   :  { %v740_v55 = vadd.f32 %v739_v49, %v727_v53 }
 0x1f2   :  { %v753_v60 = vadd.f32 %v752_v51, %v740_v55  ;;  %v1498_v55 = vld [vmem:[%s2113_s3 + $0x68] sm:$0xff] }
 0x1f4   :  { %v779_v63 = vpack.c.bf16 %v753_v60, %v753_v60  ;;  %v1497_v60 = vld [vmem:[%s2113_s3 + $0x60] sm:$0xff] }
 0x1f5   :  { %v728_v20 = vpop.f32.mrf.mxu2 }
 0x1f6   :  { %v1495_v20 = vld [vmem:[%s2113_s3 + $0x50] sm:$0xff]  ;;  %s1216_s3 = sld [smem:[#allocation3]] }
 0x1fd   :  { %v774_v58 = vpop.f32.mrf.mxu2 }
 0x1fe   :  { %v775_v59 = vadd.f32 %v1556_v57, %v774_v58 }
 0x200   :  { %v778_v46 = vmax.f32 %v775_v59, 0.0  ;;  %v1615_v59 = vmov 0.5  }
 0x202   :  { %v780_v11 = vpack.c.bf16 %v778_v46, %v778_v46 }
 0x204   :  { %v782_v61 = vunpack.c.l.b16 %v780_v11 }
 0x205   :  { %v776_v42 = vpop.f32.mrf.mxu2 }
 0x206   :  { %v783_v15 = vpack.c.b16 %v782_v61, %v782_v61 }
 0x208   :  { %784 = vrot.lane.b32.xlu0 %v783_v15, %s1612_s21 }
 0x27a   :  { %v785_v2 = vpop.permute.xlu0 %784 }
 0x27b   :  { %v789_v3 = vsel %vm786_vm3, %v779_v63, %v785_v2 }
 0x27c   :  { %1456 = vmatmul.msk.bf16.vlgmr.msra.gmra.mxu3 %vm815_vm4, %v789_v3 }
 0x2ff   :  { %v827_v5 = vpop.f32.mrf.mxu3 }
 0x300   :  { %v1978_v6 = vadd.f32 %v1557_v0, %v827_v5 }
 0x302   :  { %v831_v7 = vmul.f32 %v1978_v6, %v1978_v6  ;;  %v1145_v57 = vpack.c.bf16 %v1978_v6, %v1978_v6 }
 0x304   :  { %869 = vrot.lane.b32.xlu1 %v831_v7, %s1613_s24  ;;  %850 = vrot.lane.b32.xlu0 %v831_v7, %s1614_s25  ;;  %v833_v22 = vsel %vm832_vm5, %v831_v7, 0.0  ;;  %v1149_v58 = vsel %vm1146_vm15, %v1145_v57, 0  ;;  %v888_v7 = vlaneseq }
 0x307   :  { %v829_v8 = vpop.f32.mrf.mxu3 }
 0x376   :  { %v870_v12 = vpop.permute.xlu1 %869  ;;  %v851_v16 = vpop.permute.xlu0 %850 }
 0x377   :  { %v872_v18 = vsel %vm832_vm5, %v870_v12, 0.0  ;;  %v853_v54 = vsel %vm832_vm5, %v851_v16, 0.0 }
 0x378   :  { %873 = vadd.xlane.f32.xlu2 %v872_v18  ;;  %854 = vadd.xlane.f32.xlu1 %v853_v54  ;;  %v2018_v18 = vshrl.u32 %v888_v7, 7  ;;  %v2020_v54 = vand.u32 127, %v888_v7 }
 0x37a   :  { %vm1215_vm4 = vcmp.eq.s32.totalorder %v2018_v18, 0  ;;  %vm1251_vm15 = vcmp.eq.s32.totalorder %v2020_v54, 2 }
 0x380   :  { %834 = vadd.xlane.f32.xlu2 %v833_v22 }
 0x3eb   :  { %v874_v24 = vpop.xlane.xlu2 %873  ;;  %v855_v47 = vpop.xlane.xlu1 %854 }
 0x3ec   :  { %v875_v19 = vadd.f32 1e-08, %v874_v24  ;;  %v856_v23 = vadd.f32 1e-08, %v855_v47 }
 0x3ee   :  { %1559 = vrsqrt.f32 %v875_v19  ;;  %vm882_vm8 = vweird.f32 %v875_v19  ;;  %vm863_vm10 = vweird.f32 %v856_v23 }
 0x3ef   :  { %1561 = vrsqrt.f32 %v856_v23 }
 0x3f3   :  { %v835_v41 = vpop.xlane.xlu2 %834 }
 0x3f4   :  { %v1560_v27 = vpop.eup %1559  ;;  %v836_v43 = vadd.f32 1e-08, %v835_v41 }
 0x3f5   :  { %v1562_v10 = vpop.eup %1561  ;;  %v877_v14 = vmul.f32 %v1560_v27, %v875_v19  ;;  %vm883_vm6 = vweird.f32 %v1560_v27 }
 0x3f6   :  { %v858_v9 = vmul.f32 %v1562_v10, %v856_v23  ;;  %vm864_vm7 = vweird.f32 %v1562_v10  ;;  %vm884_vm9 = vmor %vm882_vm8, %vm883_vm6  ;;  %1563 = vrsqrt.f32 %v836_v43  ;;  %vm843_vm13 = vweird.f32 %v836_v43 }
 0x3f7   :  { %v878_v28 = vmul.f32 %v1560_v27, %v877_v14  ;;  %vm865_vm11 = vmor %vm863_vm10, %vm864_vm7  ;;  %1565 = vrcp.f32 %v1615_v59  ;;  %vm1222_vm6 = vcmp.eq.s32.totalorder %v2018_v18, 1  ;;  %vm1203_vm10 = vcmp.lt.s32.totalorder %v2020_v54, 3 }
 0x3f8   :  { %v859_v29 = vmul.f32 %v1562_v10, %v858_v9  ;;  %v1616_v9 = vmov 0.0  }
 0x3f9   :  { %v879_v35 = vmul.f32 0.5, %v878_v28 }
 0x3fa   :  { %v860_v30 = vmul.f32 0.5, %v859_v29 }
 0x3fb   :  { %v880_v31 = vsub.f32 1.5, %v879_v35 }
 0x3fc   :  { %v861_v21 = vsub.f32 1.5, %v860_v30  ;;  %v1564_v34 = vpop.eup %1563 }
 0x3fd   :  { %v881_v32 = vmul.f32 %v1560_v27, %v880_v31  ;;  %v838_v45 = vmul.f32 %v1564_v34, %v836_v43  ;;  %vm844_vm12 = vweird.f32 %v1564_v34  ;;  %v1566_v46 = vpop.eup %1565 }
 0x3fe   :  { %v862_v4 = vmul.f32 %v1562_v10, %v861_v21  ;;  %vm845_vm14 = vmor %vm843_vm13, %vm844_vm12  ;;  %v918_v11 = vmul.f32 0.5, %v1566_v46  ;;  %vm922_vm1 = vweird.f32 %v1566_v46  ;;  %vm943_vm12 = vcmask 1041408  }
 0x3ff   :  { %v885_v33 = vsel %vm884_vm9, %v1560_v27, %v881_v32  ;;  %v839_v25 = vmul.f32 %v1564_v34, %v838_v45  ;;  %v1217_v45 = vstv %s1216_s3 }
 0x400   :  { %v866_v36 = vsel %vm865_vm11, %v1562_v10, %v862_v4  ;;  %v886_v38 = vmul.f32 %v885_v33, %v1978_v6  ;;  %v919_v61 = vsub.f32 1.0, %v918_v11  ;;  %vm1218_vm5 = vcmp.eq.s32.totalorder %v2020_v54, %v1217_v45 }
 0x401   :  { %v867_v62 = vmul.f32 %v866_v36, %v1978_v6  ;;  %v840_v37 = vmul.f32 0.5, %v839_v25  ;;  %vm1219_vm8 = vmand %vm1215_vm4, %vm1218_vm5  ;;  %vm985_vm11 = vcmask 15360  }
 0x402   :  { %v887_v1 = vpack.c.bf16 %v886_v38, %v886_v38  ;;  %v920_v42 = vmul.f32 %v1566_v46, %v919_v61  ;;  %v1220_v59 = vsel %vm1219_vm8, 1.0, %v1616_v9 }
 0x403   :  { %v868_v40 = vpack.c.bf16 %v867_v62, %v867_v62  ;;  %v841_v52 = vsub.f32 1.5, %v840_v37 }
 0x404   :  { %994 = vrot.lane.b32.xlu2 %v887_v1, %s1613_s24  ;;  %v921_v15 = vadd.f32 %v1566_v46, %v920_v42  ;;  %v1558_v42 = vld [vmem:[%s2114_s4 + $0x3] ss:$0 sm:$0xff] }
 0x405   :  { %896 = vrot.lane.b32.xlu0 %v868_v40, %s1614_s25  ;;  %v842_v44 = vmul.f32 %v1564_v34, %v841_v52  ;;  %v1224_v52 = vstv %s1486_s12 }
 0x406   :  { %v923_v63 = vsel %vm922_vm1, %v1566_v46, %v921_v15  ;;  %vm1225_vm7 = vcmp.eq.s32.totalorder %v2020_v54, %v1224_v52  ;;  %vm1249_vm1 = vcmp.eq.s32.totalorder %v2020_v54, 0 }
 0x407   :  { %v846_v49 = vsel %vm845_vm14, %v1564_v34, %v842_v44  ;;  %vm1226_vm9 = vmand %vm1222_vm6, %vm1225_vm7  ;;  %vm1232_vm14 = vcmp.lt.s32.totalorder %v2018_v18, 2 }
 0x408   :  { %v847_v39 = vmul.f32 %v846_v49, %v1978_v6  ;;  %v1227_v46 = vsel %vm1226_vm9, 1.0, %v1616_v9 }
 0x40a   :  { %v848_v48 = vpack.c.bf16 %v847_v39, %v847_v39 }
 0x45e   :  { %v995_v51 = vpop.permute.xlu2 %994 }
 0x45f   :  { %v997_v13 = vsel %vm786_vm3, %v995_v51, 0 }
 0x460   :  { %1006 = vmatpush.bf16.xpose.msrb.mxu3 %v997_v13  ;;  %1079 = vmatpush.bf16.xpose.msrb.mxu1 %v997_v13 }
 0x467   :  { %1459 = vmatmul.msk.bf16.vlgmr.msrb.gmra.mxu3 %vm786_vm3, %v848_v48 }
 0x477   :  { %v897_v50 = vpop.permute.xlu0 %896 }
 0x478   :  { %v902_v53 = vsel %vm786_vm3, %v897_v50, 0  ;;  %1460 = vmatmul.msk.bf16.vlgmr.msrb.gmra.mxu1 %vm786_vm3, %v897_v50 }
 0x479   :  { %911 = vmatpush.bf16.xpose.msrb.mxu2 %v902_v53 }
 0x480   :  { %1458 = vmatmul.msk.bf16.vlgmr.msrb.gmra.mxu2 %vm786_vm3, %v848_v48  ;;  %vm892_vm3 = vcmp.eq.s32.totalorder %v2018_v18, %v2020_v54 }
 0x481   :  { %1192 = vmatpush.bf16.msra.mxu2 %v1500_v26  ;;  %v1457_v28 = vsel %vm892_vm3, 1.0, %v1616_v9 }
 0x485   :  { %1193 = vmatpush.bf16.msra.mxu2 %v1499_v17 }
 0x489   :  { %1194 = vmatpush.bf16.msra.mxu2 %v1498_v55 }
 0x48d   :  { %1195 = vmatpush.bf16.msra.mxu2 %v1497_v60 }
 0x491   :  { %1196 = vmatpush.bf16.msra.mxu2 %v1496_v56 }
 0x495   :  { %1197 = vmatpush.bf16.msra.mxu2 %v1495_v20 }
 0x498   :  { %1485 = vmatmul.msk.bf16.vlgmr.msra.gmra.mxu2 %vm1187_vm0, %v1149_v58  ;;  %vm1250_vm0 = vcmp.eq.s32.totalorder %v2020_v54, 1 }
 0x4ea   :  { %v1008_v2 = vpop.f32.mrf.mxu3 }
 0x4eb   :  { %v2014_v3 = vmul.f32 %v1008_v2, %v923_v63 }
 0x4ed   :  { %v1013_v0 = vsel %vm925_vm2, %v2014_v3, -inf  ;;  %v1025_v31 = vmul.f32 %v1457_v28, %v2014_v3 }
 0x4ee   :  { %1014 = vmax.xlane.f32.xlu2 %v1013_v0  ;;  %v1038_v5 = vrot.slane %v1013_v0, 4 }
 0x4ef   :  { %v2034_v4 = vsel %vm925_vm2, %v1025_v31, 0.0 }
 0x4f0   :  { %v1039_v6 = vmax.f32 %v1013_v0, %v1038_v5  ;;  %v1057_v40 = vrot.slane %v2034_v4, 4  ;;  %v1228_v5 = vadd.f32 %v1227_v46, %v1220_v59 }
 0x4f2   :  { %v1040_v8 = vrot.slane %v1039_v6, 2  ;;  %v1010_v12 = vpop.f32.mrf.mxu3  ;;  %v1058_v39 = vadd.f32 %v1057_v40, %v2034_v4 }
 0x4f4   :  { %v1041_v16 = vmax.f32 %v1039_v6, %v1040_v8  ;;  %v1059_v60 = vrot.slane %v1058_v39, 2 }
 0x4f5   :  { %v1081_v22 = vpop.f32.mrf.mxu1 }
 0x4f6   :  { %v1042_v24 = vrot.slane %v1041_v16, 1  ;;  %v2022_v47 = vmul.f32 %v1081_v22, %v923_v63  ;;  %v1060_v0 = vadd.f32 %v1059_v60, %v1058_v39 }
 0x4f8   :  { %v1086_v19 = vsel %vm925_vm2, %v2022_v47, -inf  ;;  %v2028_v23 = vmax.f32 %v1041_v16, %v1042_v24  ;;  %v1098_v50 = vmul.f32 %v1457_v28, %v2022_v47 }
 0x4f9   :  { %1087 = vmax.xlane.f32.xlu1 %v1086_v19  ;;  %v1111_v27 = vrot.slane %v1086_v19, 4 }
 0x4fa   :  { %v1044_v10 = vsub.f32 %v2014_v3, %v2028_v23  ;;  %v2058_v58 = vsel %vm925_vm2, %v1098_v50, 0.0 }
 0x4fb   :  { %v1112_v14 = vmax.f32 %v1086_v19, %v1111_v27  ;;  %v1130_v2 = vrot.slane %v2058_v58, 4  ;;  %v1061_v19 = vrot.slane %v1060_v0, 1 }
 0x4fc   :  { %v1045_v29 = vmul.f32 1.442695, %v1044_v10 }
 0x4fd   :  { %v1113_v35 = vrot.slane %v1112_v14, 2  ;;  %v1083_v30 = vpop.f32.mrf.mxu1  ;;  %v1131_v24 = vadd.f32 %v1130_v2, %v2058_v58 }
 0x4fe   :  { %1567 = vpow2.f32 %v1045_v29 }
 0x4ff   :  { %v1114_v21 = vmax.f32 %v1112_v14, %v1113_v35  ;;  %v1132_v35 = vrot.slane %v1131_v24, 2 }
 0x501   :  { %v1115_v32 = vrot.slane %v1114_v21, 1 }
 0x503   :  { %v913_v33 = vpop.f32.mrf.mxu2  ;;  %v2036_v36 = vmax.f32 %v1114_v21, %v1115_v32  ;;  %v1062_v21 = vadd.f32 %v1061_v19, %v1060_v0 }
 0x504   :  { %v1568_v38 = vpop.eup %1567  ;;  %v2038_v62 = vmul.f32 %v923_v63, %v913_v33 }
 0x505   :  { %v1117_v1 = vsub.f32 %v2022_v47, %v2036_v36  ;;  %v1047_v41 = vsel %vm925_vm2, %v1568_v38, 0.0 }
 0x506   :  { %v926_v43 = vsel %vm925_vm2, %v2038_v62, -inf  ;;  %v938_v34 = vmul.f32 %v1457_v28, %v2038_v62  ;;  %v1048_v25 = vrot.slane %v1047_v41, 4 }
 0x507   :  { %927 = vmax.xlane.f32.xlu0 %v926_v43  ;;  %v959_v37 = vrot.slane %v926_v43, 4  ;;  %v1118_v44 = vmul.f32 1.442695, %v1117_v1  ;;  %v1133_v1 = vadd.f32 %v1132_v35, %v1131_v24 }
 0x508   :  { %v2048_v49 = vsel %vm925_vm2, %v938_v34, 0.0  ;;  %v1049_v51 = vadd.f32 %v1048_v25, %v1047_v41 }
 0x509   :  { %v960_v13 = vmax.f32 %v926_v43, %v959_v37  ;;  %940 = vadd.xlane.f32.xlu2 %v2048_v49  ;;  %1569 = vpow2.f32 %v1118_v44  ;;  %v978_v34 = vrot.slane %v2048_v49, 4  ;;  %v1134_v25 = vrot.slane %v1133_v1, 1 }
 0x50a   :  { %v1050_v48 = vrot.slane %v1049_v51, 2 }
 0x50b   :  { %v961_v26 = vrot.slane %v960_v13, 2  ;;  %v915_v53 = vpop.f32.mrf.mxu2  ;;  %v1135_v39 = vadd.f32 %v1134_v25, %v1133_v1 }
 0x50c   :  { %v1051_v17 = vadd.f32 %v1050_v48, %v1049_v51 }
 0x50d   :  { %v962_v55 = vmax.f32 %v960_v13, %v961_v26 }
 0x50e   :  { %v1052_v56 = vrot.slane %v1051_v17, 1 }
 0x50f   :  { %v1570_v20 = vpop.eup %1569  ;;  %v963_v57 = vrot.slane %v962_v55, 1 }
 0x510   :  { %v1120_v11 = vsel %vm925_vm2, %v1570_v20, 0.0  ;;  %v1053_v61 = vadd.f32 %v1052_v56, %v1051_v17 }
 0x511   :  { %v1121_v15 = vrot.slane %v1120_v11, 4  ;;  %v964_v63 = vmax.f32 %v962_v55, %v963_v57 }
 0x512   :  { %1571 = vlog2.f32 %v1053_v61 }
 0x513   :  { %v1122_v6 = vadd.f32 %v1121_v15, %v1120_v11  ;;  %v965_v7 = vsub.f32 %v2038_v62, %v964_v63 }
 0x515   :  { %v1123_v16 = vrot.slane %v1122_v6, 2  ;;  %v966_v22 = vmul.f32 1.442695, %v965_v7 }
 0x517   :  { %v1124_v14 = vadd.f32 %v1123_v16, %v1122_v6  ;;  %1573 = vpow2.f32 %v966_v22 }
 0x518   :  { %v1572_v9 = vpop.eup %1571 }
 0x519   :  { %v1125_v28 = vrot.slane %v1124_v14, 1  ;;  %v1055_v29 = vmul.f32 0.6931472, %v1572_v9  ;;  %v1617_v9 = vmov 2.0  }
 0x51b   :  { %v1199_v8 = vpop.f32.mrf.mxu2  ;;  %v1126_v30 = vadd.f32 %v1125_v28, %v1124_v14  ;;  %v1056_v31 = vadd.f32 %v1055_v29, %v2028_v23  ;;  %v979_v23 = vadd.f32 %v978_v34, %v2048_v49 }
 0x51c   :  { %v2067_v12 = vadd.f32 %v1558_v42, %v1199_v8 }
 0x51d   :  { %v1574_v33 = vpop.eup %1573  ;;  %1575 = vlog2.f32 %v1126_v30  ;;  %v1063_v38 = vsub.f32 %v1056_v31, %v1062_v21  ;;  %v980_v26 = vrot.slane %v979_v23, 2 }
 0x51e   :  { %v2071_v27 = vsel %vm1203_vm10, %v2067_v12, -1e+30  ;;  %v1229_v10 = vmul.f32 %v1228_v5, %v2067_v12  ;;  %v968_v40 = vsel %vm925_vm2, %v1574_v33, 0.0 }
 0x51f   :  { %1205 = vmax.xlane.f32.xlu1 %v2071_v27  ;;  %v969_v41 = vrot.slane %v968_v40, 4  ;;  %v1064_v43 = vsel %vm985_vm11, %v1063_v38, 0.0  ;;  %v981_v55 = vadd.f32 %v980_v26, %v979_v23 }
 0x520   :  { %1230 = vadd.xlane.f32.xlu2 %v1229_v10 }
 0x521   :  { %v970_v45 = vadd.f32 %v969_v41, %v968_v40  ;;  %v982_v60 = vrot.slane %v981_v55, 1 }
 0x523   :  { %v1201_v32 = vpop.f32.mrf.mxu2  ;;  %v1576_v37 = vpop.eup %1575  ;;  %v971_v52 = vrot.slane %v970_v45, 2  ;;  %v983_v59 = vadd.f32 %v982_v60, %v981_v55 }
 0x524   :  { %v1128_v44 = vmul.f32 0.6931472, %v1576_v37 }
 0x525   :  { %v972_v51 = vadd.f32 %v971_v52, %v970_v45 }
 0x526   :  { %v1129_v13 = vadd.f32 %v1128_v44, %v2036_v36 }
 0x527   :  { %v973_v48 = vrot.slane %v972_v51, 1 }
 0x528   :  { %v1136_v50 = vsub.f32 %v1129_v13, %v1135_v39 }
 0x529   :  { %v974_v53 = vadd.f32 %v973_v48, %v972_v51 }
 0x52a   :  { %v1137_v17 = vsel %vm985_vm11, %v1136_v50, 0.0 }
 0x52b   :  { %1138 = vadd.xlane.f32.xlu2 %v1137_v17  ;;  %1577 = vlog2.f32 %v974_v53 }
 0x531   :  { %v1578_v56 = vpop.eup %1577 }
 0x532   :  { %v976_v20 = vmul.f32 0.6931472, %v1578_v56 }
 0x534   :  { %v977_v57 = vadd.f32 %v976_v20, %v964_v63 }
 0x536   :  { %v984_v49 = vsub.f32 %v977_v57, %v983_v59 }
 0x538   :  { %v986_v46 = vsel %vm985_vm11, %v984_v49, 0.0 }
 0x561   :  { %v1015_v11 = vpop.xlane.xlu2 %1014 }
 0x562   :  { %v1016_v36 = vsub.f32 %v2014_v3, %v1015_v11 }
 0x564   :  { %v1017_v61 = vmul.f32 1.442695, %v1016_v36 }
 0x566   :  { %1579 = vpow2.f32 %v1017_v61 }
 0x56c   :  { %v1580_v42 = vpop.eup %1579  ;;  %v1088_v2 = vpop.xlane.xlu1 %1087 }
 0x56d   :  { %v1019_v15 = vsel %vm925_vm2, %v1580_v42, 0.0  ;;  %v1089_v6 = vsub.f32 %v2022_v47, %v1088_v2 }
 0x56e   :  { %1020 = vadd.xlane.f32.xlu1 %v1019_v15 }
 0x56f   :  { %v1090_v7 = vmul.f32 1.442695, %v1089_v6 }
 0x57a   :  { %v928_v0 = vpop.xlane.xlu0 %927 }
 0x57b   :  { %v929_v5 = vsub.f32 %v2038_v62, %v928_v0 }
 0x57c   :  { %v941_v31 = vpop.xlane.xlu2 %940 }
 0x57d   :  { %v930_v63 = vmul.f32 1.442695, %v929_v5 }
 0x57f   :  { %1581 = vpow2.f32 %v930_v63 }
 0x580   :  { %1583 = vpow2.f32 %v1090_v7 }
 0x585   :  { %v1582_v8 = vpop.eup %1581 }
 0x586   :  { %v932_v16 = vsel %vm925_vm2, %v1582_v8, 0.0  ;;  %v1584_v3 = vpop.eup %1583 }
 0x587   :  { %933 = vadd.xlane.f32.xlu0 %v932_v16  ;;  %v1092_v10 = vsel %vm925_vm2, %v1584_v3, 0.0  ;;  %vm1255_vm2 = vcmp.eq.s32.totalorder %v2018_v18, 7 }
 0x58f   :  { %1093 = vadd.xlane.f32.xlu0 %v1092_v10 }
 0x592   :  { %v1206_v22 = vpop.xlane.xlu1 %1205 }
 0x593   :  { %v1207_v24 = vsub.f32 %v2071_v27, %v1206_v22  ;;  %v1231_v57 = vpop.xlane.xlu2 %1230 }
 0x595   :  { %v1208_v19 = vmul.f32 1.442695, %v1207_v24 }
 0x597   :  { %1585 = vpow2.f32 %v1208_v19  ;;  %1027 = vadd.xlane.f32.xlu0 %v2034_v4 }
 0x59d   :  { %v1586_v62 = vpop.eup %1585 }
 0x59e   :  { %1210 = vadd.xlane.f32.xlu1 %v1586_v62 }
 0x59f   :  { %987 = vadd.xlane.f32.xlu0 %v986_v46 }
 0x5a6   :  { %1100 = vadd.xlane.f32.xlu1 %v2058_v58 }
 0x5ae   :  { %1065 = vadd.xlane.f32.xlu1 %v1064_v43 }
 0x5e1   :  { %v1021_v47 = vpop.xlane.xlu1 %1020 }
 0x5fa   :  { %v934_v14 = vpop.xlane.xlu0 %933 }
 0x5fb   :  { %1587 = vlog2.f32 %v934_v14 }
 0x5fc   :  { %1589 = vlog2.f32 %v1021_v47 }
 0x5fd   :  { %1591 = vrcp.f32 %v1617_v9  ;;  %v1139_v9 = vpop.xlane.xlu2 %1138 }
 0x601   :  { %v1588_v27 = vpop.eup %1587 }
 0x602   :  { %v1590_v28 = vpop.eup %1589  ;;  %v936_v29 = vmul.f32 0.6931472, %v1588_v27  ;;  %v1094_v35 = vpop.xlane.xlu0 %1093 }
 0x603   :  { %1593 = vlog2.f32 %v1094_v35  ;;  %v1023_v21 = vmul.f32 0.6931472, %v1590_v28  ;;  %v1592_v4 = vpop.eup %1591 }
 0x604   :  { %v937_v30 = vadd.f32 %v936_v29, %v928_v0  ;;  %v952_v33 = vmul.f32 2.0, %v1592_v4  ;;  %vm956_vm13 = vweird.f32 %v1592_v4 }
 0x605   :  { %v1024_v1 = vadd.f32 %v1023_v21, %v1015_v11 }
 0x606   :  { %v942_v32 = vsub.f32 %v937_v30, %v941_v31  ;;  %v953_v25 = vsub.f32 1.0, %v952_v33 }
 0x608   :  { %v944_v58 = vsel %vm943_vm12, %v942_v32, 0.0  ;;  %v954_v48 = vmul.f32 %v1592_v4, %v953_v25 }
 0x609   :  { %v945_v38 = vrot.slane %v944_v58, 4  ;;  %v1594_v40 = vpop.eup %1593 }
 0x60a   :  { %v1028_v41 = vpop.xlane.xlu0 %1027  ;;  %v1096_v37 = vmul.f32 0.6931472, %v1594_v40  ;;  %v955_v59 = vadd.f32 %v1592_v4, %v954_v48 }
 0x60b   :  { %v946_v34 = vadd.f32 %v945_v38, %v944_v58  ;;  %v1029_v45 = vsub.f32 %v1024_v1, %v1028_v41 }
 0x60c   :  { %v1097_v26 = vadd.f32 %v1096_v37, %v1088_v2  ;;  %v957_v0 = vsel %vm956_vm13, %v1592_v4, %v955_v59 }
 0x60d   :  { %v947_v52 = vrot.slane %v946_v34, 2  ;;  %v1030_v23 = vsel %vm943_vm12, %v1029_v45, 0.0  ;;  %v1140_v30 = vmul.f32 %v1139_v9, %v957_v0 }
 0x60e   :  { %v1031_v44 = vrot.slane %v1030_v23, 4 }
 0x60f   :  { %v948_v51 = vadd.f32 %v947_v52, %v946_v34  ;;  %v1246_v34 = vstv %s1245_s2 }
 0x610   :  { %v1032_v13 = vadd.f32 %v1031_v44, %v1030_v23 }
 0x611   :  { %v1211_v43 = vpop.xlane.xlu1 %1210  ;;  %v949_v17 = vrot.slane %v948_v51, 1 }
 0x612   :  { %1595 = vlog2.f32 %v1211_v43  ;;  %v1033_v50 = vrot.slane %v1032_v13, 2  ;;  %v988_v6 = vpop.xlane.xlu0 %987  ;;  %v1243_v43 = vstv %s2116_s6 }
 0x613   :  { %v950_v36 = vadd.f32 %v949_v17, %v948_v51  ;;  %v989_v24 = vmul.f32 %v988_v6, %v957_v0 }
 0x614   :  { %v1034_v56 = vadd.f32 %v1033_v50, %v1032_v13 }
 0x615   :  { %v958_v63 = vmul.f32 %v957_v0, %v950_v36 }
 0x616   :  { %v1035_v46 = vrot.slane %v1034_v56, 1 }
 0x617   :  { %v990_v47 = vadd.f32 %v989_v24, %v958_v63 }
 0x618   :  { %v1596_v39 = vpop.eup %1595  ;;  %v1036_v2 = vadd.f32 %v1035_v46, %v1034_v56 }
 0x619   :  { %v1213_v53 = vmul.f32 0.6931472, %v1596_v39  ;;  %v1101_v55 = vpop.xlane.xlu1 %1100  ;;  %v991_v31 = vmul.f32 0.5, %v990_v47 }
 0x61a   :  { %v1102_v60 = vsub.f32 %v1097_v26, %v1101_v55  ;;  %v1037_v8 = vmul.f32 %v1036_v2, %v957_v0 }
 0x61b   :  { %v1214_v20 = vadd.f32 %v1213_v53, %v1206_v22  ;;  %v992_v33 = vmul.f32 0.4, %v991_v31 }
 0x61c   :  { %v1103_v49 = vsel %vm943_vm12, %v1102_v60, 0.0 }
 0x61d   :  { %v1233_v11 = vsub.f32 %v1214_v20, %v1231_v57  ;;  %v1104_v61 = vrot.slane %v1103_v49, 4 }
 0x61f   :  { %v1234_v42 = vsel %vm1232_vm14, %v1233_v11, 0.0  ;;  %v1105_v15 = vadd.f32 %v1104_v61, %v1103_v49 }
 0x620   :  { %v1235_v5 = vrot.slane %v1234_v42, 4 }
 0x621   :  { %v1106_v7 = vrot.slane %v1105_v15, 2  ;;  %v1066_v16 = vpop.xlane.xlu1 %1065 }
 0x622   :  { %v1236_v3 = vadd.f32 %v1235_v5, %v1234_v42  ;;  %v1067_v22 = vmul.f32 %v1066_v16, %v957_v0 }
 0x623   :  { %v1107_v19 = vadd.f32 %v1106_v7, %v1105_v15 }
 0x624   :  { %v1237_v10 = vrot.slane %v1236_v3, 2  ;;  %v1068_v62 = vadd.f32 %v1067_v22, %v1037_v8 }
 0x625   :  { %v1108_v14 = vrot.slane %v1107_v19, 1 }
 0x626   :  { %v1238_v27 = vadd.f32 %v1237_v10, %v1236_v3  ;;  %v1069_v29 = vmul.f32 0.5, %v1068_v62 }
 0x627   :  { %v1109_v28 = vadd.f32 %v1108_v14, %v1107_v19 }
 0x628   :  { %v1239_v35 = vrot.slane %v1238_v27, 1  ;;  %v1070_v58 = vmul.f32 0.3, %v1069_v29 }
 0x629   :  { %v1110_v21 = vmul.f32 %v1109_v28, %v957_v0 }
 0x62a   :  { %v1240_v4 = vadd.f32 %v1239_v35, %v1238_v27  ;;  %v1071_v41 = vadd.f32 %v1070_v58, %v992_v33 }
 0x62b   :  { %v1141_v32 = vadd.f32 %v1140_v30, %v1110_v21 }
 0x62c   :  { %v1241_v1 = vmul.f32 %v1240_v4, %v957_v0 }
 0x62d   :  { %v1142_v38 = vmul.f32 0.5, %v1141_v32 }
 0x62e   :  { %v1247_v25 = vmul.f32 %v1246_v34, %v1241_v1 }
 0x62f   :  { %v1143_v40 = vmul.f32 0.3, %v1142_v38 }
 0x631   :  { %v1144_v45 = vadd.f32 %v1143_v40, %v1071_v41 }
 0x633   :  { %v1244_v37 = vmul.f32 %v1243_v43, %v1144_v45  ;;  %v1252_v52 = vsel %vm1251_vm15, %v1144_v45, 0.0 }
 0x634   :  { %v1253_v44 = vsel %vm1250_vm0, %v1241_v1, %v1252_v52 }
 0x635   :  { %v1248_v23 = vadd.f32 %v1247_v25, %v1244_v37 }
 0x637   :  { %v1254_v51 = vsel %vm1249_vm1, %v1248_v23, %v1253_v44 }
 0x638   :  { %v1256_v13 = vsel %vm1255_vm2, %v1254_v51, %v2067_v12 }
 0x639   :  { %1257 = vst [vmem:[%s2117_s7] sm:$0xff] %v1256_v13 }
 0x63a   :  { %1262 = vsyncpa [#allocation4], 1 }

</bundles_post_ra>
